<compile_context>
chip_gen: v6e
topology: v6e:2x2x1
jax: 0.10.0
libtpu: 0.0.40
codegen_flags: <defaults>
</compile_context>

<pallas_src>
import math
from functools import partial

import jax
import jax.numpy as jnp
from jax.experimental import pallas as pl
from jax.experimental.pallas import tpu as pltpu

_INV_SQRT2 = 1.0 / math.sqrt(2.0)


# ----------------------------------------------------------------------------
# Small matmul + bias + activation kernel (diffusion-step MLP).  M is tiled so
# the call pipelines and never needs the whole (M,K)/(M,N) in VMEM at once.
# ----------------------------------------------------------------------------
def _matmul_bias_act_kernel(x_ref, w_ref, b_ref, o_ref, *, act):
    y = jnp.dot(x_ref[...], w_ref[...], preferred_element_type=jnp.float32)
    y = y + b_ref[...]
    if act == "relu":
        y = jnp.maximum(y, 0.0)
    elif act == "mish":
        # Mish(x) = x * tanh(softplus(x)); numerically stable softplus, f32.
        sp = jnp.maximum(y, 0.0) + jnp.log1p(jnp.exp(-jnp.abs(y)))
        y = y * jnp.tanh(sp)
    o_ref[...] = y.astype(o_ref.dtype)


def matmul_bias_act(x, w, b, act="none", block_m=512):
    M, K = x.shape
    N = w.shape[1]
    tm = min(block_m, M)
    return pl.pallas_call(
        partial(_matmul_bias_act_kernel, act=act),
        grid=(pl.cdiv(M, tm),),
        in_specs=[pl.BlockSpec((tm, K), lambda i: (i, 0)),
                  pl.BlockSpec((K, N), lambda i: (0, 0)),
                  pl.BlockSpec((1, N), lambda i: (0, 0))],
        out_specs=pl.BlockSpec((tm, N), lambda i: (i, 0)),
        out_shape=jax.ShapeDtypeStruct((M, N), jnp.float32),
        compiler_params=pltpu.CompilerParams(
            dimension_semantics=("parallel",)),
    )(x, w, b.reshape(1, N))


# ----------------------------------------------------------------------------
# Fused WavNet stack kernel.
# grid = (B, L).  Scratch carries the residual state and the skip sum across
# the (inner, "arbitrary") layer axis; weights for layer l are streamed in.
# ----------------------------------------------------------------------------
def _wavnet_stack_kernel(dil_ref,                       # SMEM scalar prefetch
                         x_raw_ref, cond_ref, dstep_ref,
                         w_in_ref, b_in_ref,
                         w_cat_ref, b_cat_ref,
                         w_res_ref, b_res_ref,
                         w_skip_ref, b_skip_ref,
                         w_out_ref, b_out_ref,
                         out_ref,
                         x_sc, skip_sc, y_sc,
                         *, channels, pad, num_layers, inv_sqrt_layers,
                         mxu_dtype):
    C = channels
    T = x_sc.shape[0]
    layer = pl.program_id(1)

    # ---- layer 0: fused input_projection + ReLU, reset carried state --------
    @pl.when(layer == 0)
    def _init():
        h = jnp.dot(x_raw_ref[...], w_in_ref[...],
                    preferred_element_type=jnp.float32) + b_in_ref[...]
        x_sc[...] = jnp.maximum(h, 0.0)
        skip_sc[...] = jnp.zeros_like(skip_sc)
        y_sc[...] = jnp.zeros_like(y_sc)        # zero the conv halo rows

    x = x_sc[...]                               # (T, C) f32 residual state
    y = x + dstep_ref[...]                      # + per-layer diffusion step
    y_sc[pl.ds(pad, T), :] = y                  # center of the zero-halo buf

    d = dil_ref[layer]                          # this layer's dilation (SMEM)
    y_prev = y_sc[pl.ds(pad - d, T), :]         # y[t - d]  (zero padded)
    y_next = y_sc[pl.ds(pad + d, T), :]         # y[t + d]  (zero padded)

    # Fused dilated 3-tap conv + conditioner projection: one K=4C MXU matmul.
    cat = jnp.concatenate(
        [y_prev.astype(mxu_dtype), y.astype(mxu_dtype),
         y_next.astype(mxu_dtype), cond_ref[...]], axis=1)         # (T, 4C)
    conv = (jnp.dot(cat, w_cat_ref[...], preferred_element_type=jnp.float32)
            + b_cat_ref[...])                                      # (T, 2C) f32

    # gated activation (f32 on the VPU/EUP path)
    z = jax.nn.sigmoid(conv[:, :C]) * jnp.tanh(conv[:, C:])        # (T, C)

    # output_projection (1x1 conv C -> 2C): residual | skip
    proj = (jnp.dot(z.astype(mxu_dtype), w_res_ref[...],
                    preferred_element_type=jnp.float32)
            + b_res_ref[...])                                      # (T, 2C)

    x_sc[...] = (x + proj[:, :C]) * _INV_SQRT2        # residual for next layer
    skip_sc[...] = skip_sc[...] + proj[:, C:]         # running skip sum (f32)

    # ---- last layer: fused skip head (skip_proj + ReLU + output_proj) -------
    @pl.when(layer == num_layers - 1)
    def _head():
        s = skip_sc[...] * inv_sqrt_layers
        h = (jnp.dot(s.astype(mxu_dtype), w_skip_ref[...],
                     preferred_element_type=jnp.float32) + b_skip_ref[...])
        h = jnp.maximum(h, 0.0)
        o = (jnp.dot(h.astype(mxu_dtype), w_out_ref[...],
                     preferred_element_type=jnp.float32) + b_out_ref[...])
        out_ref[...] = o.astype(out_ref.dtype)


# ----------------------------------------------------------------------------
# Parameter init (synthetic, deterministic) — mirrors the PyTorch module.
# Per-layer tap weights + conditioner projection are stored pre-fused (4C, 2C).
# ----------------------------------------------------------------------------
def init_params(key, *, in_dims, out_dims, residual_layers, residual_channels,
                dilation_cycle_length, pe_scale, param_dtype=jnp.bfloat16):
    C = residual_channels
    L = residual_layers
    keys = iter(jax.random.split(key, 16 + 8 * L))
    nk = lambda: next(keys)

    def wn(shape, fan_in, dtype=param_dtype):      # kaiming-normal-ish
        return (jax.random.normal(nk(), shape, jnp.float32)
                * math.sqrt(2.0 / fan_in)).astype(dtype)

    def bn(n):
        return jax.random.normal(nk(), (1, n), jnp.float32) * 0.02

    dilations = [2 ** (i % dilation_cycle_length) for i in range(L)]
    pad = max(8, -(-max(dilations) // 8) * 8)      # halo, rounded to sublanes

    w_cat, b_cat, w_res, b_res, wdp, bdp = [], [], [], [], [], []
    for _ in range(L):
        # fused [conv tap(t-d); tap(t); tap(t+d); conditioner_projection]
        w_cat.append(wn((4 * C, 2 * C), 3 * C))
        b_cat.append(bn(2 * C) + bn(2 * C))        # dilated-conv bias + cond bias
        w_res.append(wn((C, 2 * C), C))            # output_projection (1x1)
        b_res.append(bn(2 * C))
        wdp.append(wn((C, C), C, dtype=jnp.float32))   # diffusion_projection
        bdp.append(bn(C))

    return {
        "residual_channels": C,
        "num_layers": L,
        "pe_scale": float(pe_scale),
        "conv_pad": pad,
        "dilations": jnp.asarray(dilations, jnp.int32),
        "w_in": wn((in_dims, C), in_dims),         # input_projection (1x1)
        "b_in": bn(C),
        "mlp_w1": wn((C, 4 * C), C, dtype=jnp.float32),
        "mlp_b1": bn(4 * C),
        "mlp_w2": wn((4 * C, C), 4 * C, dtype=jnp.float32),
        "mlp_b2": bn(C),
        "w_cat": jnp.stack(w_cat),                 # (L, 4C, 2C)
        "b_cat": jnp.stack(b_cat),                 # (L, 1, 2C)
        "w_res": jnp.stack(w_res),                 # (L, C, 2C)
        "b_res": jnp.stack(b_res),                 # (L, 1, 2C)
        "wdp": jnp.stack(wdp),                     # (L, C, C)
        "bdp": jnp.stack(bdp),                     # (L, 1, C)
        "w_skip": wn((C, C), C),                   # skip_projection (1x1)
        "b_skip": bn(C),
        "w_out": jnp.zeros((C, out_dims), param_dtype),   # nn.init.zeros_
        "b_out": bn(out_dims),
    }


# ----------------------------------------------------------------------------
# DropNormWavNet forward
# ----------------------------------------------------------------------------
def wavnet_forward(params, x_in, diffusion_step, cond_audio, cond_keyla):
    """x_in: (B, in_dims, T), diffusion_step: (B,), cond_*: (B, C, T)
    -> (B, out_dims, T)"""
    B, in_dims, T = x_in.shape
    C = params["residual_channels"]
    L = params["num_layers"]
    pad = params["conv_pad"]
    mxu_dtype = params["w_cat"].dtype
    out_dims = params["w_out"].shape[1]

    # conditioning: add + transpose once (XLA fuses this); reused by all layers
    cond = (cond_audio + cond_keyla).transpose(0, 2, 1).astype(mxu_dtype)
    x_raw = x_in.transpose(0, 2, 1).astype(mxu_dtype)             # (B, T, in)

    # diffusion step: sinusoidal embedding (tiny plain-JAX glue) + MLP (Pallas)
    half = C // 2
    freq = jnp.exp(jnp.arange(half, dtype=jnp.float32)
                   * (-math.log(10000.0) / (half - 1)))
    e = (diffusion_step.astype(jnp.float32)[:, None] * freq[None, :]
         * params["pe_scale"])
    demb = jnp.concatenate([jnp.sin(e), jnp.cos(e)], axis=-1)     # (B, C)
    h = matmul_bias_act(demb, params["mlp_w1"], params["mlp_b1"], act="mish")
    dstep = matmul_bias_act(h, params["mlp_w2"], params["mlp_b2"], act="none")

    # per-layer diffusion projections, hoisted out of the hot kernel (tiny)
    dstep_all = (jnp.einsum("bk,lkc->blc", dstep, params["wdp"])
                 + params["bdp"][None, :, 0, :])                  # (B, L, C)
    dstep_all = dstep_all.reshape(B * L, 1, C).astype(jnp.float32)

    # advisory cost estimate for the fused stack
    wb = jnp.dtype(mxu_dtype).itemsize
    flops = int(2 * B * T * in_dims * C
                + B * L * (2 * T * 4 * C * 2 * C + 2 * T * C * 2 * C)
                + B * (2 * T * C * C + 2 * T * C * out_dims))
    bytes_accessed = int(B * T * (in_dims + C) * wb
                         + L * (4 * C * 2 * C + C * 2 * C) * wb
                         + B * T * out_dims * 4)
    cost = pl.CostEstimate(flops=flops,
                           transcendentals=int(2 * B * L * T * C),
                           bytes_accessed=bytes_accessed)

    kern = partial(_wavnet_stack_kernel,
                   channels=C, pad=pad, num_layers=L,
                   inv_sqrt_layers=1.0 / math.sqrt(L),
                   mxu_dtype=mxu_dtype)

    grid_spec = pltpu.PrefetchScalarGridSpec(
        num_scalar_prefetch=1,                      # per-layer dilation table
        grid=(B, L),
        in_specs=[
            pl.BlockSpec((None, T, in_dims), lambda b, l, dil: (b, 0, 0)),
            pl.BlockSpec((None, T, C), lambda b, l, dil: (b, 0, 0)),
            pl.BlockSpec((None, 1, C), lambda b, l, dil: (b * L + l, 0, 0)),
            pl.BlockSpec((in_dims, C), lambda b, l, dil: (0, 0)),       # w_in
            pl.BlockSpec((1, C), lambda b, l, dil: (0, 0)),             # b_in
            pl.BlockSpec((None, 4 * C, 2 * C), lambda b, l, dil: (l, 0, 0)),
            pl.BlockSpec((None, 1, 2 * C), lambda b, l, dil: (l, 0, 0)),
            pl.BlockSpec((None, C, 2 * C), lambda b, l, dil: (l, 0, 0)),
            pl.BlockSpec((None, 1, 2 * C), lambda b, l, dil: (l, 0, 0)),
            pl.BlockSpec((C, C), lambda b, l, dil: (0, 0)),             # w_skip
            pl.BlockSpec((1, C), lambda b, l, dil: (0, 0)),             # b_skip
            pl.BlockSpec((C, out_dims), lambda b, l, dil: (0, 0)),      # w_out
            pl.BlockSpec((1, out_dims), lambda b, l, dil: (0, 0)),      # b_out
        ],
        out_specs=pl.BlockSpec((None, T, out_dims),
                               lambda b, l, dil: (b, 0, 0)),
        scratch_shapes=[
            pltpu.VMEM((T, C), jnp.float32),             # residual state x
            pltpu.VMEM((T, C), jnp.float32),             # skip accumulator
            pltpu.VMEM((T + 2 * pad, C), jnp.float32),   # zero-halo conv buf
        ],
    )

    out_btc = pl.pallas_call(
        kern,
        grid_spec=grid_spec,
        out_shape=jax.ShapeDtypeStruct((B, T, out_dims), jnp.float32),
        compiler_params=pltpu.CompilerParams(
            dimension_semantics=("parallel", "arbitrary"),
            vmem_limit_bytes=48 * 1024 * 1024),
        cost_estimate=cost,
    )(params["dilations"], x_raw, cond, dstep_all,
      params["w_in"], params["b_in"],
      params["w_cat"], params["b_cat"],
      params["w_res"], params["b_res"],
      params["w_skip"], params["b_skip"],
      params["w_out"], params["b_out"])

    return out_btc.transpose(0, 2, 1)                    # (B, out_dims, T)


if __name__ == "__main__":
    B, T = 2, 64
    in_dims, out_dims = 8, 8
    residual_channels = 128          # lane-aligned (multiple of 128)
    residual_layers = 4
    dilation_cycle_length = 2
    pe_scale = 1

    root = jax.random.PRNGKey(0)
    kp, kx, kc1, kc2, kt = jax.random.split(root, 5)

    params = init_params(kp, in_dims=in_dims, out_dims=out_dims,
                         residual_layers=residual_layers,
                         residual_channels=residual_channels,
                         dilation_cycle_length=dilation_cycle_length,
                         pe_scale=pe_scale)

    x = jax.random.normal(kx, (B, in_dims, T), jnp.float32)
    cond_audio = jax.random.normal(kc1, (B, residual_channels, T), jnp.float32)
    cond_keyla = jax.random.normal(kc2, (B, residual_channels, T), jnp.float32)
    diffusion_step = jax.random.uniform(kt, (B,), jnp.float32, 0.0, 100.0)

    @jax.jit
    def fwd(x_in, t, ca, ck):
        return wavnet_forward(params, x_in, t, ca, ck)

    out = fwd(x, diffusion_step, cond_audio, cond_keyla)
    out = jax.block_until_ready(out)
    assert out.shape == (B, out_dims, T), out.shape
    assert bool(jnp.all(jnp.isfinite(out)))
    print("KERNEL_OK")
</pallas_src>

<mosaic_0001>
module attributes {stable_mosaic.version = 11 : i64} {
  func.func @_matmul_bias_act_kernel(%arg0: i32, %arg1: memref<2x512xf32, #tpu.memory_space<vmem>>, %arg2: memref<512x128xf32, #tpu.memory_space<vmem>>, %arg3: memref<1x128xf32, #tpu.memory_space<vmem>>, %arg4: memref<2x128xf32, #tpu.memory_space<vmem>>) attributes {dimension_semantics = [#tpu.dimension_semantics<parallel>], iteration_bounds = array<i64: 1>, scalar_prefetch = 0 : i64, scratch_operands = 0 : i64, tpu.core_type = #tpu.core_type<tc>, window_params = [{transform_indices = @transform_0, window_bounds = array<i64: 2, 512>}, {pipeline_mode = #tpu.pipeline_mode<synchronous>, transform_indices = @transform_1, window_bounds = array<i64: 512, 128>}, {pipeline_mode = #tpu.pipeline_mode<synchronous>, transform_indices = @transform_2, window_bounds = array<i64: 1, 128>}, {transform_indices = @transform_3, window_bounds = array<i64: 2, 128>}]} {
    %c0 = arith.constant 0 : index
    %c0_0 = arith.constant 0 : index
    %0 = vector.load %arg1[%c0, %c0_0] : memref<2x512xf32, #tpu.memory_space<vmem>>, vector<2x512xf32>
    %c0_1 = arith.constant 0 : index
    %c0_2 = arith.constant 0 : index
    %1 = vector.load %arg2[%c0_1, %c0_2] : memref<512x128xf32, #tpu.memory_space<vmem>>, vector<512x128xf32>
    %cst = arith.constant dense<0.000000e+00> : vector<2x128xf32>
    %2 = tpu.matmul %0, %1, %cst {dimension_numbers = #tpu.dot_dimension_numbers<[1], [0], [0], [1], [0, 0, 1, 1], [], []>} : vector<2x512xf32>, vector<512x128xf32>, vector<2x128xf32> -> vector<2x128xf32>
    %c0_3 = arith.constant 0 : index
    %c0_4 = arith.constant 0 : index
    %3 = vector.load %arg3[%c0_3, %c0_4] : memref<1x128xf32, #tpu.memory_space<vmem>>, vector<1x128xf32>
    %4 = vector.broadcast %3 : vector<1x128xf32> to vector<2x128xf32>
    %5 = arith.addf %2, %4 : vector<2x128xf32>
    %c0_5 = arith.constant 0 : index
    %c0_6 = arith.constant 0 : index
    %6 = vector.load %arg4[%c0_5, %c0_6] : memref<2x128xf32, #tpu.memory_space<vmem>>, vector<2x128xf32>
    tpu.vector_store %arg4[%c0_5, %c0_6], %5 {strides = array<i32>} : memref<2x128xf32, #tpu.memory_space<vmem>>, vector<2x128xf32>,
    return
  }
  func.func @transform_0(%arg0: i32) -> (i32, i32) {
    %c0_i32 = arith.constant 0 : i32
    %c0_i32_0 = arith.constant 0 : i32
    return %arg0, %c0_i32 : i32, i32
  }
  func.func @transform_1(%arg0: i32) -> (i32, i32) {
    %c0_i32 = arith.constant 0 : i32
    %c0_i32_0 = arith.constant 0 : i32
    %c0_i32_1 = arith.constant 0 : i32
    return %c0_i32, %c0_i32_0 : i32, i32
  }
  func.func @transform_2(%arg0: i32) -> (i32, i32) {
    %c0_i32 = arith.constant 0 : i32
    %c0_i32_0 = arith.constant 0 : i32
    %c0_i32_1 = arith.constant 0 : i32
    return %c0_i32, %c0_i32_0 : i32, i32
  }
  func.func @transform_3(%arg0: i32) -> (i32, i32) {
    %c0_i32 = arith.constant 0 : i32
    %c0_i32_0 = arith.constant 0 : i32
    return %arg0, %c0_i32 : i32, i32
  }
}

module attributes {stable_mosaic.version = 11 : i64} {
  func.func @_matmul_bias_act_kernel(%arg0: i32, %arg1: memref<2x128xf32, #tpu.memory_space<vmem>>, %arg2: memref<128x512xf32, #tpu.memory_space<vmem>>, %arg3: memref<1x512xf32, #tpu.memory_space<vmem>>, %arg4: memref<2x512xf32, #tpu.memory_space<vmem>>) attributes {dimension_semantics = [#tpu.dimension_semantics<parallel>], iteration_bounds = array<i64: 1>, scalar_prefetch = 0 : i64, scratch_operands = 0 : i64, tpu.core_type = #tpu.core_type<tc>, window_params = [{transform_indices = @transform_0, window_bounds = array<i64: 2, 128>}, {pipeline_mode = #tpu.pipeline_mode<synchronous>, transform_indices = @transform_1, window_bounds = array<i64: 128, 512>}, {pipeline_mode = #tpu.pipeline_mode<synchronous>, transform_indices = @transform_2, window_bounds = array<i64: 1, 512>}, {transform_indices = @transform_3, window_bounds = array<i64: 2, 512>}]} {
    %c0 = arith.constant 0 : index
    %c0_0 = arith.constant 0 : index
    %0 = vector.load %arg1[%c0, %c0_0] : memref<2x128xf32, #tpu.memory_space<vmem>>, vector<2x128xf32>
    %c0_1 = arith.constant 0 : index
    %c0_2 = arith.constant 0 : index
    %1 = vector.load %arg2[%c0_1, %c0_2] : memref<128x512xf32, #tpu.memory_space<vmem>>, vector<128x512xf32>
    %cst = arith.constant dense<0.000000e+00> : vector<2x512xf32>
    %2 = tpu.matmul %0, %1, %cst {dimension_numbers = #tpu.dot_dimension_numbers<[1], [0], [0], [1], [0, 0, 1, 1], [], []>} : vector<2x128xf32>, vector<128x512xf32>, vector<2x512xf32> -> vector<2x512xf32>
    %c0_3 = arith.constant 0 : index
    %c0_4 = arith.constant 0 : index
    %3 = vector.load %arg3[%c0_3, %c0_4] : memref<1x512xf32, #tpu.memory_space<vmem>>, vector<1x512xf32>
    %4 = vector.broadcast %3 : vector<1x512xf32> to vector<2x512xf32>
    %5 = arith.addf %2, %4 : vector<2x512xf32>
    %cst_5 = arith.constant 0.000000e+00 : f32
    %6 = vector.broadcast %cst_5 : f32 to vector<2x512xf32>
    %7 = arith.maximumf %5, %6 : vector<2x512xf32>
    %8 = math.absf %5 : vector<2x512xf32>
    %cst_6 = arith.constant 0.000000e+00 : f32
    %9 = vector.broadcast %cst_6 : f32 to vector<2x512xf32>
    %10 = arith.subf %9, %8 : vector<2x512xf32>
    %11 = math.exp %10 : vector<2x512xf32>
    %12 = math.log1p %11 : vector<2x512xf32>
    %13 = arith.addf %7, %12 : vector<2x512xf32>
    %14 = math.tanh %13 : vector<2x512xf32>
    %15 = arith.mulf %5, %14 : vector<2x512xf32>
    %c0_7 = arith.constant 0 : index
    %c0_8 = arith.constant 0 : index
    %16 = vector.load %arg4[%c0_7, %c0_8] : memref<2x512xf32, #tpu.memory_space<vmem>>, vector<2x512xf32>
    tpu.vector_store %arg4[%c0_7, %c0_8], %15 {strides = array<i32>} : memref<2x512xf32, #tpu.memory_space<vmem>>, vector<2x512xf32>,
    return
  }
  func.func @transform_0(%arg0: i32) -> (i32, i32) {
    %c0_i32 = arith.constant 0 : i32
    %c0_i32_0 = arith.constant 0 : i32
    return %arg0, %c0_i32 : i32, i32
  }
  func.func @transform_1(%arg0: i32) -> (i32, i32) {
    %c0_i32 = arith.constant 0 : i32
    %c0_i32_0 = arith.constant 0 : i32
    %c0_i32_1 = arith.constant 0 : i32
    return %c0_i32, %c0_i32_0 : i32, i32
  }
  func.func @transform_2(%arg0: i32) -> (i32, i32) {
    %c0_i32 = arith.constant 0 : i32
    %c0_i32_0 = arith.constant 0 : i32
    %c0_i32_1 = arith.constant 0 : i32
    return %c0_i32, %c0_i32_0 : i32, i32
  }
  func.func @transform_3(%arg0: i32) -> (i32, i32) {
    %c0_i32 = arith.constant 0 : i32
    %c0_i32_0 = arith.constant 0 : i32
    return %arg0, %c0_i32 : i32, i32
  }
}

module attributes {stable_mosaic.version = 11 : i64} {
  func.func @_wavnet_stack_kernel(%arg0: i32, %arg1: i32, %arg2: memref<4xi32, #tpu.memory_space<smem>>, %arg3: memref<1x64x8xbf16, #tpu.memory_space<vmem>>, %arg4: memref<1x64x128xbf16, #tpu.memory_space<vmem>>, %arg5: memref<1x1x128xf32, #tpu.memory_space<vmem>>, %arg6: memref<8x128xbf16, #tpu.memory_space<vmem>>, %arg7: memref<1x128xf32, #tpu.memory_space<vmem>>, %arg8: memref<1x512x256xbf16, #tpu.memory_space<vmem>>, %arg9: memref<1x1x256xf32, #tpu.memory_space<vmem>>, %arg10: memref<1x128x256xbf16, #tpu.memory_space<vmem>>, %arg11: memref<1x1x256xf32, #tpu.memory_space<vmem>>, %arg12: memref<128x128xbf16, #tpu.memory_space<vmem>>, %arg13: memref<1x128xf32, #tpu.memory_space<vmem>>, %arg14: memref<128x8xbf16, #tpu.memory_space<vmem>>, %arg15: memref<1x8xf32, #tpu.memory_space<vmem>>, %arg16: memref<1x64x8xf32, #tpu.memory_space<vmem>>, %arg17: memref<64x128xf32, #tpu.memory_space<vmem>>, %arg18: memref<64x128xf32, #tpu.memory_space<vmem>>, %arg19: memref<80x128xf32, #tpu.memory_space<vmem>>) attributes {dimension_semantics = [#tpu.dimension_semantics<parallel>, #tpu.dimension_semantics<arbitrary>], iteration_bounds = array<i64: 2, 4>, scalar_prefetch = 1 : i64, scratch_operands = 3 : i64, tpu.core_type = #tpu.core_type<tc>, window_params = [{transform_indices = @transform_0, window_bounds = array<i64: 1, 64, 8>}, {transform_indices = @transform_1, window_bounds = array<i64: 1, 64, 128>}, {transform_indices = @transform_2, window_bounds = array<i64: 1, 1, 128>}, {pipeline_mode = #tpu.pipeline_mode<synchronous>, transform_indices = @transform_3, window_bounds = array<i64: 8, 128>}, {pipeline_mode = #tpu.pipeline_mode<synchronous>, transform_indices = @transform_4, window_bounds = array<i64: 1, 128>}, {transform_indices = @transform_5, window_bounds = array<i64: 1, 512, 256>}, {transform_indices = @transform_6, window_bounds = array<i64: 1, 1, 256>}, {transform_indices = @transform_7, window_bounds = array<i64: 1, 128, 256>}, {transform_indices = @transform_8, window_bounds = array<i64: 1, 1, 256>}, {pipeline_mode = #tpu.pipeline_mode<synchronous>, transform_indices = @transform_9, window_bounds = array<i64: 128, 128>}, {pipeline_mode = #tpu.pipeline_mode<synchronous>, transform_indices = @transform_10, window_bounds = array<i64: 1, 128>}, {pipeline_mode = #tpu.pipeline_mode<synchronous>, transform_indices = @transform_11, window_bounds = array<i64: 128, 8>}, {pipeline_mode = #tpu.pipeline_mode<synchronous>, transform_indices = @transform_12, window_bounds = array<i64: 1, 8>}, {transform_indices = @transform_13, window_bounds = array<i64: 1, 64, 8>}]} {
    %c0_i32 = arith.constant 0 : i32
    %0 = arith.cmpi eq, %arg1, %c0_i32 : i32
    %1 = arith.extui %0 : i1 to i32
    %c0_i32_0 = arith.constant 0 : i32
    %2 = arith.cmpi ne, %1, %c0_i32_0 : i32
    scf.if %2 {
      %c0_34 = arith.constant 0 : index
      %c0_35 = arith.constant 0 : index
      %c0_36 = arith.constant 0 : index
      %59 = vector.load %arg3[%c0_34, %c0_35, %c0_36] : memref<1x64x8xbf16, #tpu.memory_space<vmem>>, vector<1x64x8xbf16>
      %60 = vector.shape_cast %59 : vector<1x64x8xbf16> to vector<64x8xbf16>
      %c0_37 = arith.constant 0 : index
      %c0_38 = arith.constant 0 : index
      %61 = vector.load %arg6[%c0_37, %c0_38] : memref<8x128xbf16, #tpu.memory_space<vmem>>, vector<8x128xbf16>
      %cst_39 = arith.constant dense<0.000000e+00> : vector<64x128xf32>
      %62 = tpu.matmul %60, %61, %cst_39 {dimension_numbers = #tpu.dot_dimension_numbers<[1], [0], [0], [1], [0, 0, 1, 1], [], []>} : vector<64x8xbf16>, vector<8x128xbf16>, vector<64x128xf32> -> vector<64x128xf32>
      %c0_40 = arith.constant 0 : index
      %c0_41 = arith.constant 0 : index
      %63 = vector.load %arg7[%c0_40, %c0_41] : memref<1x128xf32, #tpu.memory_space<vmem>>, vector<1x128xf32>
      %64 = vector.broadcast %63 : vector<1x128xf32> to vector<64x128xf32>
      %65 = arith.addf %62, %64 : vector<64x128xf32>
      %cst_42 = arith.constant 0.000000e+00 : f32
      %66 = vector.broadcast %cst_42 : f32 to vector<64x128xf32>
      %67 = arith.maximumf %65, %66 : vector<64x128xf32>
      %c0_43 = arith.constant 0 : index
      %c0_44 = arith.constant 0 : index
      %68 = vector.load %arg17[%c0_43, %c0_44] : memref<64x128xf32, #tpu.memory_space<vmem>>, vector<64x128xf32>
      tpu.vector_store %arg17[%c0_43, %c0_44], %67 {strides = array<i32>} : memref<64x128xf32, #tpu.memory_space<vmem>>, vector<64x128xf32>,
      %cst_45 = arith.constant 0.000000e+00 : f32
      %69 = vector.broadcast %cst_45 : f32 to vector<64x128xf32>
      %c0_46 = arith.constant 0 : index
      %c0_47 = arith.constant 0 : index
      %70 = vector.load %arg18[%c0_46, %c0_47] : memref<64x128xf32, #tpu.memory_space<vmem>>, vector<64x128xf32>
      tpu.vector_store %arg18[%c0_46, %c0_47], %69 {strides = array<i32>} : memref<64x128xf32, #tpu.memory_space<vmem>>, vector<64x128xf32>,
      %cst_48 = arith.constant 0.000000e+00 : f32
      %71 = vector.broadcast %cst_48 : f32 to vector<80x128xf32>
      %c0_49 = arith.constant 0 : index
      %c0_50 = arith.constant 0 : index
      %72 = vector.load %arg19[%c0_49, %c0_50] : memref<80x128xf32, #tpu.memory_space<vmem>>, vector<80x128xf32>
      tpu.vector_store %arg19[%c0_49, %c0_50], %71 {strides = array<i32>} : memref<80x128xf32, #tpu.memory_space<vmem>>, vector<80x128xf32>,
    } else {
    }
    %c0 = arith.constant 0 : index
    %c0_1 = arith.constant 0 : index
    %3 = vector.load %arg17[%c0, %c0_1] : memref<64x128xf32, #tpu.memory_space<vmem>>, vector<64x128xf32>
    %c0_2 = arith.constant 0 : index
    %c0_3 = arith.constant 0 : index
    %c0_4 = arith.constant 0 : index
    %4 = vector.load %arg5[%c0_2, %c0_3, %c0_4] : memref<1x1x128xf32, #tpu.memory_space<vmem>>, vector<1x1x128xf32>
    %5 = vector.shape_cast %4 : vector<1x1x128xf32> to vector<1x128xf32>
    %6 = vector.broadcast %5 : vector<1x128xf32> to vector<64x128xf32>
    %7 = arith.addf %3, %6 : vector<64x128xf32>
    %c8 = arith.constant 8 : index
    %c0_5 = arith.constant 0 : index
    %8 = vector.load %arg19[%c8, %c0_5] : memref<80x128xf32, #tpu.memory_space<vmem>>, vector<64x128xf32>
    tpu.vector_store %arg19[%c8, %c0_5], %7 {strides = array<i32>} : memref<80x128xf32, #tpu.memory_space<vmem>>, vector<64x128xf32>,
    %9 = arith.index_cast %arg1 : i32 to index
    %10 = memref.load %arg2[%9] : memref<4xi32, #tpu.memory_space<smem>>
    %c8_i32 = arith.constant 8 : i32
    %11 = arith.subi %c8_i32, %10 : i32
    %12 = arith.index_cast %11 : i32 to index
    %c0_6 = arith.constant 0 : index
    %13 = vector.load %arg19[%12, %c0_6] : memref<80x128xf32, #tpu.memory_space<vmem>>, vector<64x128xf32>
    %c8_i32_7 = arith.constant 8 : i32
    %14 = arith.addi %c8_i32_7, %10 : i32
    %15 = arith.index_cast %14 : i32 to index
    %c0_8 = arith.constant 0 : index
    %16 = vector.load %arg19[%15, %c0_8] : memref<80x128xf32, #tpu.memory_space<vmem>>, vector<64x128xf32>
    %17 = arith.truncf %13 : vector<64x128xf32> to vector<64x128xbf16>
    %18 = arith.truncf %7 : vector<64x128xf32> to vector<64x128xbf16>
    %19 = arith.truncf %16 : vector<64x128xf32> to vector<64x128xbf16>
    %c0_9 = arith.constant 0 : index
    %c0_10 = arith.constant 0 : index
    %c0_11 = arith.constant 0 : index
    %20 = vector.load %arg4[%c0_9, %c0_10, %c0_11] : memref<1x64x128xbf16, #tpu.memory_space<vmem>>, vector<1x64x128xbf16>
    %21 = vector.shape_cast %20 : vector<1x64x128xbf16> to vector<64x128xbf16>
    %22 = tpu.concatenate %17, %18, %19, %21 in 1 : vector<64x128xbf16>, vector<64x128xbf16>, vector<64x128xbf16>, vector<64x128xbf16> -> vector<64x512xbf16>
    %c0_12 = arith.constant 0 : index
    %c0_13 = arith.constant 0 : index
    %c0_14 = arith.constant 0 : index
    %23 = vector.load %arg8[%c0_12, %c0_13, %c0_14] : memref<1x512x256xbf16, #tpu.memory_space<vmem>>, vector<1x512x256xbf16>
    %24 = vector.shape_cast %23 : vector<1x512x256xbf16> to vector<512x256xbf16>
    %cst = arith.constant dense<0.000000e+00> : vector<64x256xf32>
    %25 = tpu.matmul %22, %24, %cst {dimension_numbers = #tpu.dot_dimension_numbers<[1], [0], [0], [1], [0, 0, 1, 1], [], []>} : vector<64x512xbf16>, vector<512x256xbf16>, vector<64x256xf32> -> vector<64x256xf32>
    %c0_15 = arith.constant 0 : index
    %c0_16 = arith.constant 0 : index
    %c0_17 = arith.constant 0 : index
    %26 = vector.load %arg9[%c0_15, %c0_16, %c0_17] : memref<1x1x256xf32, #tpu.memory_space<vmem>>, vector<1x1x256xf32>
    %27 = vector.shape_cast %26 : vector<1x1x256xf32> to vector<1x256xf32>
    %28 = vector.broadcast %27 : vector<1x256xf32> to vector<64x256xf32>
    %29 = arith.addf %25, %28 : vector<64x256xf32>
    %30 = vector.extract_strided_slice %29 {offsets = [0, 0], sizes = [64, 128], strides = [1, 1]} : vector<64x256xf32> to vector<64x128xf32>
    %31 = arith.negf %30 : vector<64x128xf32>
    %32 = math.exp %31 : vector<64x128xf32>
    %cst_18 = arith.constant 1.000000e+00 : f32
    %33 = vector.broadcast %cst_18 : f32 to vector<64x128xf32>
    %34 = arith.addf %33, %32 : vector<64x128xf32>
    %35 = arith.divf %33, %34 : vector<64x128xf32>
    %36 = vector.extract_strided_slice %29 {offsets = [0, 128], sizes = [64, 128], strides = [1, 1]} : vector<64x256xf32> to vector<64x128xf32>
    %37 = math.tanh %36 : vector<64x128xf32>
    %38 = arith.mulf %35, %37 : vector<64x128xf32>
    %39 = arith.truncf %38 : vector<64x128xf32> to vector<64x128xbf16>
    %c0_19 = arith.constant 0 : index
    %c0_20 = arith.constant 0 : index
    %c0_21 = arith.constant 0 : index
    %40 = vector.load %arg10[%c0_19, %c0_20, %c0_21] : memref<1x128x256xbf16, #tpu.memory_space<vmem>>, vector<1x128x256xbf16>
    %41 = vector.shape_cast %40 : vector<1x128x256xbf16> to vector<128x256xbf16>
    %cst_22 = arith.constant dense<0.000000e+00> : vector<64x256xf32>
    %42 = tpu.matmul %39, %41, %cst_22 {dimension_numbers = #tpu.dot_dimension_numbers<[1], [0], [0], [1], [0, 0, 1, 1], [], []>} : vector<64x128xbf16>, vector<128x256xbf16>, vector<64x256xf32> -> vector<64x256xf32>
    %c0_23 = arith.constant 0 : index
    %c0_24 = arith.constant 0 : index
    %c0_25 = arith.constant 0 : index
    %43 = vector.load %arg11[%c0_23, %c0_24, %c0_25] : memref<1x1x256xf32, #tpu.memory_space<vmem>>, vector<1x1x256xf32>
    %44 = vector.shape_cast %43 : vector<1x1x256xf32> to vector<1x256xf32>
    %45 = vector.broadcast %44 : vector<1x256xf32> to vector<64x256xf32>
    %46 = arith.addf %42, %45 : vector<64x256xf32>
    %47 = vector.extract_strided_slice %46 {offsets = [0, 0], sizes = [64, 128], strides = [1, 1]} : vector<64x256xf32> to vector<64x128xf32>
    %48 = arith.addf %3, %47 : vector<64x128xf32>
    %cst_26 = arith.constant 0.707106769 : f32
    %49 = vector.broadcast %cst_26 : f32 to vector<64x128xf32>
    %50 = arith.mulf %48, %49 : vector<64x128xf32>
    %c0_27 = arith.constant 0 : index
    %c0_28 = arith.constant 0 : index
    %51 = vector.load %arg17[%c0_27, %c0_28] : memref<64x128xf32, #tpu.memory_space<vmem>>, vector<64x128xf32>
    tpu.vector_store %arg17[%c0_27, %c0_28], %50 {strides = array<i32>} : memref<64x128xf32, #tpu.memory_space<vmem>>, vector<64x128xf32>,
    %c0_29 = arith.constant 0 : index
    %c0_30 = arith.constant 0 : index
    %52 = vector.load %arg18[%c0_29, %c0_30] : memref<64x128xf32, #tpu.memory_space<vmem>>, vector<64x128xf32>
    %53 = vector.extract_strided_slice %46 {offsets = [0, 128], sizes = [64, 128], strides = [1, 1]} : vector<64x256xf32> to vector<64x128xf32>
    %54 = arith.addf %52, %53 : vector<64x128xf32>
    %c0_31 = arith.constant 0 : index
    %c0_32 = arith.constant 0 : index
    %55 = vector.load %arg18[%c0_31, %c0_32] : memref<64x128xf32, #tpu.memory_space<vmem>>, vector<64x128xf32>
    tpu.vector_store %arg18[%c0_31, %c0_32], %54 {strides = array<i32>} : memref<64x128xf32, #tpu.memory_space<vmem>>, vector<64x128xf32>,
    %c3_i32 = arith.constant 3 : i32
    %56 = arith.cmpi eq, %arg1, %c3_i32 : i32
    %57 = arith.extui %56 : i1 to i32
    %c0_i32_33 = arith.constant 0 : i32
    %58 = arith.cmpi ne, %57, %c0_i32_33 : i32
    scf.if %58 {
      %c0_34 = arith.constant 0 : index
      %c0_35 = arith.constant 0 : index
      %59 = vector.load %arg18[%c0_34, %c0_35] : memref<64x128xf32, #tpu.memory_space<vmem>>, vector<64x128xf32>
      %cst_36 = arith.constant 5.000000e-01 : f32
      %60 = vector.broadcast %cst_36 : f32 to vector<64x128xf32>
      %61 = arith.mulf %59, %60 : vector<64x128xf32>
      %62 = arith.truncf %61 : vector<64x128xf32> to vector<64x128xbf16>
      %c0_37 = arith.constant 0 : index
      %c0_38 = arith.constant 0 : index
      %63 = vector.load %arg12[%c0_37, %c0_38] : memref<128x128xbf16, #tpu.memory_space<vmem>>, vector<128x128xbf16>
      %cst_39 = arith.constant dense<0.000000e+00> : vector<64x128xf32>
      %64 = tpu.matmul %62, %63, %cst_39 {dimension_numbers = #tpu.dot_dimension_numbers<[1], [0], [0], [1], [0, 0, 1, 1], [], []>} : vector<64x128xbf16>, vector<128x128xbf16>, vector<64x128xf32> -> vector<64x128xf32>
      %c0_40 = arith.constant 0 : index
      %c0_41 = arith.constant 0 : index
      %65 = vector.load %arg13[%c0_40, %c0_41] : memref<1x128xf32, #tpu.memory_space<vmem>>, vector<1x128xf32>
      %66 = vector.broadcast %65 : vector<1x128xf32> to vector<64x128xf32>
      %67 = arith.addf %64, %66 : vector<64x128xf32>
      %cst_42 = arith.constant 0.000000e+00 : f32
      %68 = vector.broadcast %cst_42 : f32 to vector<64x128xf32>
      %69 = arith.maximumf %67, %68 : vector<64x128xf32>
      %70 = arith.truncf %69 : vector<64x128xf32> to vector<64x128xbf16>
      %c0_43 = arith.constant 0 : index
      %c0_44 = arith.constant 0 : index
      %71 = vector.load %arg14[%c0_43, %c0_44] : memref<128x8xbf16, #tpu.memory_space<vmem>>, vector<128x8xbf16>
      %cst_45 = arith.constant dense<0.000000e+00> : vector<64x8xf32>
      %72 = tpu.matmul %70, %71, %cst_45 {dimension_numbers = #tpu.dot_dimension_numbers<[1], [0], [0], [1], [0, 0, 1, 1], [], []>} : vector<64x128xbf16>, vector<128x8xbf16>, vector<64x8xf32> -> vector<64x8xf32>
      %c0_46 = arith.constant 0 : index
      %c0_47 = arith.constant 0 : index
      %73 = vector.load %arg15[%c0_46, %c0_47] : memref<1x8xf32, #tpu.memory_space<vmem>>, vector<1x8xf32>
      %74 = vector.broadcast %73 : vector<1x8xf32> to vector<64x8xf32>
      %75 = arith.addf %72, %74 : vector<64x8xf32>
      %c0_48 = arith.constant 0 : index
      %c0_49 = arith.constant 0 : index
      %c0_50 = arith.constant 0 : index
      %76 = vector.load %arg16[%c0_48, %c0_49, %c0_50] : memref<1x64x8xf32, #tpu.memory_space<vmem>>, vector<1x64x8xf32>
      %77 = vector.shape_cast %76 : vector<1x64x8xf32> to vector<64x8xf32>
      %78 = vector.shape_cast %75 : vector<64x8xf32> to vector<1x64x8xf32>
      tpu.vector_store %arg16[%c0_48, %c0_49, %c0_50], %78 {strides = array<i32>} : memref<1x64x8xf32, #tpu.memory_space<vmem>>, vector<1x64x8xf32>,
    } else {
    }
    return
  }
  func.func @transform_0(%arg0: i32, %arg1: i32, %arg2: memref<4xi32, #tpu.memory_space<smem>>) -> (i32, i32, i32) {
    %c0_i32 = arith.constant 0 : i32
    %c0_i32_0 = arith.constant 0 : i32
    %c0_i32_1 = arith.constant 0 : i32
    return %arg0, %c0_i32, %c0_i32_0 : i32, i32, i32
  }
  func.func @transform_1(%arg0: i32, %arg1: i32, %arg2: memref<4xi32, #tpu.memory_space<smem>>) -> (i32, i32, i32) {
    %c0_i32 = arith.constant 0 : i32
    %c0_i32_0 = arith.constant 0 : i32
    %c0_i32_1 = arith.constant 0 : i32
    return %arg0, %c0_i32, %c0_i32_0 : i32, i32, i32
  }
  func.func @transform_2(%arg0: i32, %arg1: i32, %arg2: memref<4xi32, #tpu.memory_space<smem>>) -> (i32, i32, i32) {
    %c4_i32 = arith.constant 4 : i32
    %0 = arith.muli %arg0, %c4_i32 : i32
    %1 = arith.addi %0, %arg1 : i32
    %c0_i32 = arith.constant 0 : i32
    %c0_i32_0 = arith.constant 0 : i32
    %c0_i32_1 = arith.constant 0 : i32
    return %1, %c0_i32, %c0_i32_0 : i32, i32, i32
  }
  func.func @transform_3(%arg0: i32, %arg1: i32, %arg2: memref<4xi32, #tpu.memory_space<smem>>) -> (i32, i32) {
    %c0_i32 = arith.constant 0 : i32
    %c0_i32_0 = arith.constant 0 : i32
    %c0_i32_1 = arith.constant 0 : i32
    return %c0_i32, %c0_i32_0 : i32, i32
  }
  func.func @transform_4(%arg0: i32, %arg1: i32, %arg2: memref<4xi32, #tpu.memory_space<smem>>) -> (i32, i32) {
    %c0_i32 = arith.constant 0 : i32
    %c0_i32_0 = arith.constant 0 : i32
    %c0_i32_1 = arith.constant 0 : i32
    return %c0_i32, %c0_i32_0 : i32, i32
  }
  func.func @transform_5(%arg0: i32, %arg1: i32, %arg2: memref<4xi32, #tpu.memory_space<smem>>) -> (i32, i32, i32) {
    %c0_i32 = arith.constant 0 : i32
    %c0_i32_0 = arith.constant 0 : i32
    %c0_i32_1 = arith.constant 0 : i32
    return %arg1, %c0_i32, %c0_i32_0 : i32, i32, i32
  }
  func.func @transform_6(%arg0: i32, %arg1: i32, %arg2: memref<4xi32, #tpu.memory_space<smem>>) -> (i32, i32, i32) {
    %c0_i32 = arith.constant 0 : i32
    %c0_i32_0 = arith.constant 0 : i32
    %c0_i32_1 = arith.constant 0 : i32
    return %arg1, %c0_i32, %c0_i32_0 : i32, i32, i32
  }
  func.func @transform_7(%arg0: i32, %arg1: i32, %arg2: memref<4xi32, #tpu.memory_space<smem>>) -> (i32, i32, i32) {
    %c0_i32 = arith.constant 0 : i32
    %c0_i32_0 = arith.constant 0 : i32
    %c0_i32_1 = arith.constant 0 : i32
    return %arg1, %c0_i32, %c0_i32_0 : i32, i32, i32
  }
  func.func @transform_8(%arg0: i32, %arg1: i32, %arg2: memref<4xi32, #tpu.memory_space<smem>>) -> (i32, i32, i32) {
    %c0_i32 = arith.constant 0 : i32
    %c0_i32_0 = arith.constant 0 : i32
    %c0_i32_1 = arith.constant 0 : i32
    return %arg1, %c0_i32, %c0_i32_0 : i32, i32, i32
  }
  func.func @transform_9(%arg0: i32, %arg1: i32, %arg2: memref<4xi32, #tpu.memory_space<smem>>) -> (i32, i32) {
    %c0_i32 = arith.constant 0 : i32
    %c0_i32_0 = arith.constant 0 : i32
    %c0_i32_1 = arith.constant 0 : i32
    return %c0_i32, %c0_i32_0 : i32, i32
  }
  func.func @transform_10(%arg0: i32, %arg1: i32, %arg2: memref<4xi32, #tpu.memory_space<smem>>) -> (i32, i32) {
    %c0_i32 = arith.constant 0 : i32
    %c0_i32_0 = arith.constant 0 : i32
    %c0_i32_1 = arith.constant 0 : i32
    return %c0_i32, %c0_i32_0 : i32, i32
  }
  func.func @transform_11(%arg0: i32, %arg1: i32, %arg2: memref<4xi32, #tpu.memory_space<smem>>) -> (i32, i32) {
    %c0_i32 = arith.constant 0 : i32
    %c0_i32_0 = arith.constant 0 : i32
    %c0_i32_1 = arith.constant 0 : i32
    return %c0_i32, %c0_i32_0 : i32, i32
  }
  func.func @transform_12(%arg0: i32, %arg1: i32, %arg2: memref<4xi32, #tpu.memory_space<smem>>) -> (i32, i32) {
    %c0_i32 = arith.constant 0 : i32
    %c0_i32_0 = arith.constant 0 : i32
    %c0_i32_1 = arith.constant 0 : i32
    return %c0_i32, %c0_i32_0 : i32, i32
  }
  func.func @transform_13(%arg0: i32, %arg1: i32, %arg2: memref<4xi32, #tpu.memory_space<smem>>) -> (i32, i32, i32) {
    %c0_i32 = arith.constant 0 : i32
    %c0_i32_0 = arith.constant 0 : i32
    %c0_i32_1 = arith.constant 0 : i32
    return %arg0, %c0_i32, %c0_i32_0 : i32, i32, i32
  }
}

</mosaic_0001>

<bundles_post_ra>
// kernel: fwd.4
= control target key start
LH: loop header
LB: loop body
LE: loop exit
PB: predicated region body
PF: predicated region fallthrough
CT: control target
= control target key end

     0   :  { %v326_v30 = vmov 1983009808   ;;  %v91_v32 = vlaneseq  ;;  %s548_s1 = inlined_call_operand.vmem [shape: f32[512,128], index: 1, kind: input, shape index: {}]   ;;  %s549_s0 = inlined_call_operand.vmem [shape: f32[2,512], index: 0, kind: input, shape index: {}]   ;;  %s550_s2 = inlined_call_operand.vmem [shape: f32[1,128], index: 2, kind: input, shape index: {}]   ;;  %s551_s3 = inlined_call_operand.vmem [shape: f32[2,128], index: 3, kind: output, shape index: {}]  }
   0x1   :  { %v46_v0 = vld [vmem:[%s548_s1 + $0xf8] sm:$0xff]  ;;  %v45_v4 = vld [vmem:[%s548_s1 + $0xf0] sm:$0xff]  ;;  %v44_v8 = vld [vmem:[%s548_s1 + $0xe8] sm:$0xff]  ;;  %v89_v31 = vunpack.c.l.s4 %v326_v30 }
   0x2   :  { %v78_v1 = vld [vmem:[%s548_s1 + $0x1f8] sm:$0xff]  ;;  %254 = vmatprep.subr.mxu0 %v46_v0  ;;  %v77_v5 = vld [vmem:[%s548_s1 + $0x1f0] sm:$0xff]  ;;  %v76_v9 = vld [vmem:[%s548_s1 + $0x1e8] sm:$0xff]  ;;  %v92_v42 = vshrl.u32 %v91_v32, 7 }
   0x3   :  { %v30_v2 = vld [vmem:[%s548_s1 + $0x78] sm:$0xff]  ;;  %289 = vmatprep.subr.mxu1 %v78_v1  ;;  %v29_v6 = vld [vmem:[%s548_s1 + $0x70] sm:$0xff]  ;;  %v28_v10 = vld [vmem:[%s548_s1 + $0x68] sm:$0xff]  ;;  %v90_v41 = vunpack.c.0.s8 %v89_v31 }
   0x4   :  { %v62_v3 = vld [vmem:[%s548_s1 + $0x178] sm:$0xff]  ;;  %255 = vmatpush3.msra.mxu0 %v30_v2  ;;  %v61_v7 = vld [vmem:[%s548_s1 + $0x170] sm:$0xff]  ;;  %v60_v11 = vld [vmem:[%s548_s1 + $0x168] sm:$0xff] }
   0x5   :  { %290 = vmatpush3.msra.mxu1 %v62_v3  ;;  %256 = vmatprep.subr.mxu0 %v45_v4  ;;  %v43_v12 = vld [vmem:[%s548_s1 + $0xe0] sm:$0xff]  ;;  %v42_v16 = vld [vmem:[%s548_s1 + $0xd8] sm:$0xff]  ;;  %v41_v20 = vld [vmem:[%s548_s1 + $0xd0] sm:$0xff]  ;;  %v93_v51 = vsub.s32 %v90_v41, %v92_v42 }
   0x6   :  { %291 = vmatprep.subr.mxu1 %v77_v5  ;;  %257 = vmatpush3.msra.mxu0 %v29_v6  ;;  %v75_v13 = vld [vmem:[%s548_s1 + $0x1e0] sm:$0xff]  ;;  %v74_v17 = vld [vmem:[%s548_s1 + $0x1d8] sm:$0xff]  ;;  %v73_v21 = vld [vmem:[%s548_s1 + $0x1d0] sm:$0xff] }
   0x7   :  { %292 = vmatpush3.msra.mxu1 %v61_v7  ;;  %258 = vmatprep.subr.mxu0 %v44_v8  ;;  %v27_v14 = vld [vmem:[%s548_s1 + $0x60] sm:$0xff]  ;;  %v26_v18 = vld [vmem:[%s548_s1 + $0x58] sm:$0xff]  ;;  %v25_v22 = vld [vmem:[%s548_s1 + $0x50] sm:$0xff] }
   0x8   :  { %293 = vmatprep.subr.mxu1 %v76_v9  ;;  %v59_v15 = vld [vmem:[%s548_s1 + $0x160] sm:$0xff]  ;;  %259 = vmatpush3.msra.mxu0 %v28_v10  ;;  %v58_v19 = vld [vmem:[%s548_s1 + $0x158] sm:$0xff]  ;;  %v57_v23 = vld [vmem:[%s548_s1 + $0x150] sm:$0xff] }
   0x9   :  { %294 = vmatpush3.msra.mxu1 %v60_v11  ;;  %260 = vmatprep.subr.mxu0 %v43_v12  ;;  %v40_v24 = vld [vmem:[%s548_s1 + $0xc8] sm:$0xff]  ;;  %v39_v28 = vld [vmem:[%s548_s1 + $0xc0] sm:$0xff]  ;;  %v38_v35 = vld [vmem:[%s548_s1 + $0xb8] sm:$0xff] }
   0xa   :  { %295 = vmatprep.subr.mxu1 %v75_v13  ;;  %261 = vmatpush3.msra.mxu0 %v27_v14  ;;  %v72_v25 = vld [vmem:[%s548_s1 + $0x1c8] sm:$0xff]  ;;  %v71_v29 = vld [vmem:[%s548_s1 + $0x1c0] sm:$0xff]  ;;  %v70_v36 = vld [vmem:[%s548_s1 + $0x1b8] sm:$0xff] }
   0xb   :  { %296 = vmatpush3.msra.mxu1 %v59_v15  ;;  %262 = vmatprep.subr.mxu0 %v42_v16  ;;  %v24_v26 = vld [vmem:[%s548_s1 + $0x48] sm:$0xff]  ;;  %v23_v33 = vld [vmem:[%s548_s1 + $0x40] sm:$0xff]  ;;  %v22_v37 = vld [vmem:[%s548_s1 + $0x38] sm:$0xff] }
   0xc   :  { %297 = vmatprep.subr.mxu1 %v74_v17  ;;  %263 = vmatpush3.msra.mxu0 %v26_v18  ;;  %v56_v27 = vld [vmem:[%s548_s1 + $0x148] sm:$0xff]  ;;  %v55_v34 = vld [vmem:[%s548_s1 + $0x140] sm:$0xff]  ;;  %v54_v38 = vld [vmem:[%s548_s1 + $0x138] sm:$0xff] }
   0xd   :  { %298 = vmatpush3.msra.mxu1 %v58_v19  ;;  %264 = vmatprep.subr.mxu0 %v41_v20  ;;  %v37_v39 = vld [vmem:[%s548_s1 + $0xb0] sm:$0xff]  ;;  %v36_v45 = vld [vmem:[%s548_s1 + $0xa8] sm:$0xff]  ;;  %v35_v49 = vld [vmem:[%s548_s1 + $0xa0] sm:$0xff] }
   0xe   :  { %299 = vmatprep.subr.mxu1 %v73_v21  ;;  %265 = vmatpush3.msra.mxu0 %v25_v22  ;;  %v69_v40 = vld [vmem:[%s548_s1 + $0x1b0] sm:$0xff]  ;;  %v68_v46 = vld [vmem:[%s548_s1 + $0x1a8] sm:$0xff]  ;;  %v67_v50 = vld [vmem:[%s548_s1 + $0x1a0] sm:$0xff] }
   0xf   :  { %300 = vmatpush3.msra.mxu1 %v57_v23  ;;  %266 = vmatprep.subr.mxu0 %v40_v24  ;;  %v21_v43 = vld [vmem:[%s548_s1 + $0x30] sm:$0xff]  ;;  %v20_v47 = vld [vmem:[%s548_s1 + $0x28] sm:$0xff]  ;;  %v19_v52 = vld [vmem:[%s548_s1 + $0x20] sm:$0xff] }
  0x10   :  { %301 = vmatprep.subr.mxu1 %v72_v25  ;;  %267 = vmatpush3.msra.mxu0 %v24_v26  ;;  %v53_v44 = vld [vmem:[%s548_s1 + $0x130] sm:$0xff]  ;;  %v52_v48 = vld [vmem:[%s548_s1 + $0x128] sm:$0xff]  ;;  %v51_v53 = vld [vmem:[%s548_s1 + $0x120] sm:$0xff] }
  0x11   :  { %302 = vmatpush3.msra.mxu1 %v56_v27  ;;  %268 = vmatprep.subr.mxu0 %v39_v28  ;;  %v14_v54 = vld [vmem:[%s549_s0] sm:$0xff]  ;;  %v34_v55 = vld [vmem:[%s548_s1 + $0x98] sm:$0xff]  ;;  %v33_v60 = vld [vmem:[%s548_s1 + $0x90] sm:$0xff] }
  0x12   :  { %303 = vmatprep.subr.mxu1 %v71_v29  ;;  %269 = vmatpush3.msra.mxu0 %v23_v33  ;;  %v66_v56 = vld [vmem:[%s548_s1 + $0x198] sm:$0xff]  ;;  %v87_v57 = vcombine.high %v14_v54, %v14_v54  ;;  %v65_v61 = vld [vmem:[%s548_s1 + $0x190] sm:$0xff]  ;;  %v94_v62 = vrot.slane %v14_v54, %v93_v51  ;;  %v32_v2 = vld [vmem:[%s548_s1 + $0x88] sm:$0xff] }
  0x13   :  { %304 = vmatpush3.msra.mxu1 %v55_v34  ;;  %270 = vmatprep.subr.mxu0 %v38_v35  ;;  %v18_v58 = vld [vmem:[%s548_s1 + $0x18] sm:$0xff]  ;;  %v17_v63 = vld [vmem:[%s548_s1 + $0x10] sm:$0xff]  ;;  %v64_v3 = vld [vmem:[%s548_s1 + $0x188] sm:$0xff] }
  0x14   :  { %305 = vmatprep.subr.mxu1 %v70_v36  ;;  %271 = vmatpush3.msra.mxu0 %v22_v37  ;;  %v50_v59 = vld [vmem:[%s548_s1 + $0x118] sm:$0xff]  ;;  %v49_v0 = vld [vmem:[%s548_s1 + $0x110] sm:$0xff]  ;;  %v101_v1 = vrot.slane %v87_v57, %v93_v51  ;;  %v16_v4 = vld [vmem:[%s548_s1 + $0x8] sm:$0xff]  ;;  %v102_v8 = vcombine.high %v94_v62, %v94_v62 }
  0x15   :  { %306 = vmatpush3.msra.mxu1 %v54_v38  ;;  %272 = vmatprep.subr.mxu0 %v37_v39  ;;  %v48_v5 = vld [vmem:[%s548_s1 + $0x108] sm:$0xff]  ;;  %v31_v6 = vld [vmem:[%s548_s1 + $0x80] sm:$0xff] }
  0x16   :  { %307 = vmatprep.subr.mxu1 %v69_v40  ;;  %273 = vmatpush3.msra.mxu0 %v21_v43  ;;  %v63_v7 = vld [vmem:[%s548_s1 + $0x180] sm:$0xff]  ;;  %v103_v10 = vcombine.high %v101_v1, %v101_v1 }
  0x17   :  { %308 = vmatpush3.msra.mxu1 %v53_v44  ;;  %274 = vmatprep.subr.mxu0 %v36_v45  ;;  %v15_v9 = vld [vmem:[%s548_s1] sm:$0xff] }
  0x18   :  { %309 = vmatprep.subr.mxu1 %v68_v46  ;;  %275 = vmatpush3.msra.mxu0 %v20_v47  ;;  %v47_v11 = vld [vmem:[%s548_s1 + $0x100] sm:$0xff] }
  0x19   :  { %310 = vmatpush3.msra.mxu1 %v52_v48  ;;  %276 = vmatprep.subr.mxu0 %v35_v49  ;;  %v253_v14 = vld [vmem:[%s550_s2] ss:$0 sm:$0xff] }
  0x1a   :  { %311 = vmatprep.subr.mxu1 %v67_v50  ;;  %277 = vmatpush3.msra.mxu0 %v19_v52 }
  0x1b   :  { %312 = vmatpush3.msra.mxu1 %v51_v53  ;;  %278 = vmatprep.subr.mxu0 %v34_v55 }
  0x1c   :  { %313 = vmatprep.subr.mxu1 %v66_v56  ;;  %279 = vmatpush3.msra.mxu0 %v18_v58 }
  0x1d   :  { %314 = vmatpush3.msra.mxu1 %v50_v59  ;;  %280 = vmatprep.subr.mxu0 %v33_v60 }
  0x1e   :  { %315 = vmatprep.subr.mxu1 %v65_v61  ;;  %281 = vmatpush3.msra.mxu0 %v17_v63 }
  0x1f   :  { %316 = vmatpush3.msra.mxu1 %v49_v0  ;;  %282 = vmatprep.subr.mxu0 %v32_v2 }
  0x20   :  { %317 = vmatprep.subr.mxu1 %v64_v3  ;;  %283 = vmatpush3.msra.mxu0 %v16_v4 }
  0x21   :  { %318 = vmatpush3.msra.mxu1 %v48_v5  ;;  %284 = vmatprep.subr.mxu0 %v31_v6 }
  0x22   :  { %319 = vmatprep.subr.mxu1 %v63_v7  ;;  %285 = vmatpush3.msra.mxu0 %v15_v9 }
  0x23   :  { %172 = vmatprep.mubr.f32.mxu0 %v102_v8  ;;  %320 = vmatpush3.msra.mxu1 %v47_v11 }
  0x24   :  { %242 = vmatprep.mubr.f32.mxu1 %v103_v10  ;;  %173 = vmatmul.mubr.f32.vlgmr.msra.gmra.mxu0 %v94_v62 }
  0x25   :  { %243 = vmatmul.mubr.f32.vlgmr.msra.gmra.mxu1 %v101_v1 }
  0xe4   :  { %v286_v12 = vpop.f32.mrf.mxu0 }
  0xe5   :  { %v321_v13 = vpop.f32.mrf.mxu1 }
  0xe6   :  { %v287_v15 = vpop.f32.mrf.mxu0 }
  0xe7   :  { %v322_v16 = vpop.f32.mrf.mxu1  ;;  %v288_v17 = vadd.f32 %v287_v15, %v286_v12 }
  0xe8   :  { %v323_v19 = vadd.f32 %v322_v16, %v321_v13 }
  0xe9   :  { %v175_v18 = vadd.f32 %v288_v17, %v253_v14 }
  0xeb   :  { %v245_v20 = vadd.f32 %v323_v19, %v175_v18 }
  0xed   :  { %248 = vst [vmem:[%s551_s3] sm:$0x3] %v245_v20 }

// kernel: fwd.3
= control target key start
LH: loop header
LB: loop body
LE: loop exit
PB: predicated region body
PF: predicated region fallthrough
CT: control target
= control target key end

     0   :  { %8 = vsyncpa [#allocation3], 0  ;;  %s404_s12 = smov [#allocation2]   ;;  %s468_s0 = inlined_call_operand.vmem [shape: f32[2,128], index: 0, kind: input, shape index: {}]   ;;  %s469_s1 = inlined_call_operand.hbm [shape: f32[128,512], index: 1, kind: input, shape index: {}]   ;;  %s470_s2 = inlined_call_operand.vmem [shape: f32[1,512], index: 2, kind: input, shape index: {}]   ;;  %s471_s3 = inlined_call_operand.vmem [shape: f32[2,512], index: 3, kind: output, shape index: {}]  }
   0x1   :  { %s16_s13 = sshll.u32 %s404_s12, 4  ;;  %s17_s13 = int_to_ptr.vmem [resolvable:$true] %s16_s13 }
   0x2   :  { %s390_s14 = scalar_lea.vmem %s17_s13, 8192  ;;  %p395_p1 = scmp.lt.s32.totalorder %s17_s13, %s17_s13 }
   0x3   :  { %p391_p0 = scmp.ne.s32.totalorder %s17_s13, %s390_s14  ;;  %p396_p2 = scmp.lt.s32.totalorder %s390_s14, %s390_s14 }
   0x5   :  { %p397_p3 = por %p396_p2, %p395_p1 }
   0x7   :  { %p398_p4 = pnand %p397_p3, %p391_p0 }
   0x9   :  { %401 = shalt.err (!%p398_p4)
}
   0xa   :  { %s405_s15 = smov 512   ;;  %s406_s16 = smov 32  }
   0xb   :  { %22 = dma.hbm_to_vmem [thread:$0]  %s469_s1, 8192, %s17_s13, [#allocation3], %s405_s15, %s405_s15, %s406_s16  }
   0xc   :  { %402 = dma.done.wait [#allocation3], 8192  }
   0xd   :  { %403 = vsyncadd [#allocation3], 4294959104  ;;  %v407_v0 = vmov 0.0   ;;  %v90_v1 = vld [vmem:[#allocation2 + $0x1e8] sm:$0xff]  ;;  %v92_v2 = vld [vmem:[#allocation2 + $0x1f8] sm:$0xff] }
   0xe   :  { %179 = vmatprep.mubr.f32.mxu0 %v407_v0  ;;  %250 = vmatprep.mubr.f32.mxu1 %v407_v0  ;;  %v89_v3 = vld [vmem:[#allocation2 + $0x1e0] sm:$0xff]  ;;  %v91_v4 = vld [vmem:[#allocation2 + $0x1f0] sm:$0xff]  ;;  %v86_v5 = vld [vmem:[#allocation2 + $0x1c8] sm:$0xff] }
   0xf   :  { %115 = vmatprep.subr.mxu0 %v90_v1  ;;  %186 = vmatprep.subr.mxu1 %v92_v2  ;;  %v88_v6 = vld [vmem:[#allocation2 + $0x1d8] sm:$0xff]  ;;  %v85_v7 = vld [vmem:[#allocation2 + $0x1c0] sm:$0xff]  ;;  %v87_v8 = vld [vmem:[#allocation2 + $0x1d0] sm:$0xff]  ;;  %v95_v2 = vlaneseq }
  0x10   :  { %116 = vmatpush1.msra.mxu0 %v89_v3  ;;  %187 = vmatpush1.msra.mxu1 %v91_v4  ;;  %v82_v9 = vld [vmem:[#allocation2 + $0x1a8] sm:$0xff]  ;;  %v84_v10 = vld [vmem:[#allocation2 + $0x1b8] sm:$0xff]  ;;  %v81_v11 = vld [vmem:[#allocation2 + $0x1a0] sm:$0xff] }
  0x11   :  { %117 = vmatprep.subr.mxu0 %v86_v5  ;;  %188 = vmatprep.subr.mxu1 %v88_v6  ;;  %v83_v12 = vld [vmem:[#allocation2 + $0x1b0] sm:$0xff]  ;;  %v78_v13 = vld [vmem:[#allocation2 + $0x188] sm:$0xff]  ;;  %v80_v14 = vld [vmem:[#allocation2 + $0x198] sm:$0xff]  ;;  %v435_v3 = vshrl.u32 %v95_v2, 7 }
  0x12   :  { %118 = vmatpush1.msra.mxu0 %v85_v7  ;;  %189 = vmatpush1.msra.mxu1 %v87_v8  ;;  %v77_v15 = vld [vmem:[#allocation2 + $0x180] sm:$0xff]  ;;  %v79_v16 = vld [vmem:[#allocation2 + $0x190] sm:$0xff]  ;;  %v74_v17 = vld [vmem:[#allocation2 + $0x168] sm:$0xff] }
  0x13   :  { %119 = vmatprep.subr.mxu0 %v82_v9  ;;  %190 = vmatprep.subr.mxu1 %v84_v10  ;;  %v76_v18 = vld [vmem:[#allocation2 + $0x178] sm:$0xff]  ;;  %v73_v19 = vld [vmem:[#allocation2 + $0x160] sm:$0xff]  ;;  %v75_v20 = vld [vmem:[#allocation2 + $0x170] sm:$0xff]  ;;  %v97_v4 = vsub.s32 0, %v435_v3  ;;  %v105_v5 = vsub.s32 2, %v435_v3  ;;  %v101_v7 = vsub.s32 1, %v435_v3 }
  0x14   :  { %120 = vmatpush1.msra.mxu0 %v81_v11  ;;  %191 = vmatpush1.msra.mxu1 %v83_v12  ;;  %v70_v21 = vld [vmem:[#allocation2 + $0x148] sm:$0xff]  ;;  %v72_v22 = vld [vmem:[#allocation2 + $0x158] sm:$0xff]  ;;  %v69_v23 = vld [vmem:[#allocation2 + $0x140] sm:$0xff]  ;;  %v109_v8 = vsub.s32 3, %v435_v3 }
  0x15   :  { %121 = vmatprep.subr.mxu0 %v78_v13  ;;  %192 = vmatprep.subr.mxu1 %v80_v14  ;;  %v71_v24 = vld [vmem:[#allocation2 + $0x150] sm:$0xff]  ;;  %v66_v25 = vld [vmem:[#allocation2 + $0x128] sm:$0xff]  ;;  %v68_v26 = vld [vmem:[#allocation2 + $0x138] sm:$0xff] }
  0x16   :  { %122 = vmatpush1.msra.mxu0 %v77_v15  ;;  %193 = vmatpush1.msra.mxu1 %v79_v16  ;;  %v65_v27 = vld [vmem:[#allocation2 + $0x120] sm:$0xff]  ;;  %v67_v28 = vld [vmem:[#allocation2 + $0x130] sm:$0xff]  ;;  %v62_v29 = vld [vmem:[#allocation2 + $0x108] sm:$0xff] }
  0x17   :  { %123 = vmatprep.subr.mxu0 %v74_v17  ;;  %194 = vmatprep.subr.mxu1 %v76_v18  ;;  %v64_v30 = vld [vmem:[#allocation2 + $0x118] sm:$0xff]  ;;  %v61_v31 = vld [vmem:[#allocation2 + $0x100] sm:$0xff]  ;;  %v63_v32 = vld [vmem:[#allocation2 + $0x110] sm:$0xff] }
  0x18   :  { %124 = vmatpush1.msra.mxu0 %v73_v19  ;;  %195 = vmatpush1.msra.mxu1 %v75_v20  ;;  %v58_v33 = vld [vmem:[#allocation2 + $0xe8] sm:$0xff]  ;;  %v60_v34 = vld [vmem:[#allocation2 + $0xf8] sm:$0xff]  ;;  %v57_v35 = vld [vmem:[#allocation2 + $0xe0] sm:$0xff] }
  0x19   :  { %125 = vmatprep.subr.mxu0 %v70_v21  ;;  %196 = vmatprep.subr.mxu1 %v72_v22  ;;  %v59_v36 = vld [vmem:[#allocation2 + $0xf0] sm:$0xff]  ;;  %v54_v37 = vld [vmem:[#allocation2 + $0xc8] sm:$0xff]  ;;  %v56_v38 = vld [vmem:[#allocation2 + $0xd8] sm:$0xff] }
  0x1a   :  { %126 = vmatpush1.msra.mxu0 %v69_v23  ;;  %197 = vmatpush1.msra.mxu1 %v71_v24  ;;  %v53_v39 = vld [vmem:[#allocation2 + $0xc0] sm:$0xff]  ;;  %v55_v40 = vld [vmem:[#allocation2 + $0xd0] sm:$0xff]  ;;  %v50_v41 = vld [vmem:[#allocation2 + $0xa8] sm:$0xff] }
  0x1b   :  { %127 = vmatprep.subr.mxu0 %v66_v25  ;;  %198 = vmatprep.subr.mxu1 %v68_v26  ;;  %v52_v42 = vld [vmem:[#allocation2 + $0xb8] sm:$0xff]  ;;  %v49_v43 = vld [vmem:[#allocation2 + $0xa0] sm:$0xff]  ;;  %v51_v44 = vld [vmem:[#allocation2 + $0xb0] sm:$0xff] }
  0x1c   :  { %128 = vmatpush1.msra.mxu0 %v65_v27  ;;  %199 = vmatpush1.msra.mxu1 %v67_v28  ;;  %v46_v45 = vld [vmem:[#allocation2 + $0x88] sm:$0xff]  ;;  %v48_v46 = vld [vmem:[#allocation2 + $0x98] sm:$0xff]  ;;  %v45_v47 = vld [vmem:[#allocation2 + $0x80] sm:$0xff] }
  0x1d   :  { %129 = vmatprep.subr.mxu0 %v62_v29  ;;  %200 = vmatprep.subr.mxu1 %v64_v30  ;;  %v47_v48 = vld [vmem:[#allocation2 + $0x90] sm:$0xff]  ;;  %v42_v49 = vld [vmem:[#allocation2 + $0x68] sm:$0xff]  ;;  %v44_v50 = vld [vmem:[#allocation2 + $0x78] sm:$0xff] }
  0x1e   :  { %130 = vmatpush1.msra.mxu0 %v61_v31  ;;  %201 = vmatpush1.msra.mxu1 %v63_v32  ;;  %v41_v51 = vld [vmem:[#allocation2 + $0x60] sm:$0xff]  ;;  %v43_v52 = vld [vmem:[#allocation2 + $0x70] sm:$0xff]  ;;  %v38_v53 = vld [vmem:[#allocation2 + $0x48] sm:$0xff] }
  0x1f   :  { %131 = vmatprep.subr.mxu0 %v58_v33  ;;  %202 = vmatprep.subr.mxu1 %v60_v34  ;;  %v40_v54 = vld [vmem:[#allocation2 + $0x58] sm:$0xff]  ;;  %v37_v55 = vld [vmem:[#allocation2 + $0x40] sm:$0xff]  ;;  %v39_v56 = vld [vmem:[#allocation2 + $0x50] sm:$0xff] }
  0x20   :  { %132 = vmatpush1.msra.mxu0 %v57_v35  ;;  %203 = vmatpush1.msra.mxu1 %v59_v36  ;;  %v34_v57 = vld [vmem:[#allocation2 + $0x28] sm:$0xff]  ;;  %v36_v58 = vld [vmem:[#allocation2 + $0x38] sm:$0xff]  ;;  %v33_v59 = vld [vmem:[#allocation2 + $0x20] sm:$0xff] }
  0x21   :  { %133 = vmatprep.subr.mxu0 %v54_v37  ;;  %204 = vmatprep.subr.mxu1 %v56_v38  ;;  %v35_v60 = vld [vmem:[#allocation2 + $0x30] sm:$0xff]  ;;  %v30_v61 = vld [vmem:[#allocation2 + $0x8] sm:$0xff]  ;;  %v32_v62 = vld [vmem:[#allocation2 + $0x18] sm:$0xff] }
  0x22   :  { %134 = vmatpush1.msra.mxu0 %v53_v39  ;;  %205 = vmatpush1.msra.mxu1 %v55_v40  ;;  %v29_v63 = vld [vmem:[#allocation2] sm:$0xff]  ;;  %v31_v0 = vld [vmem:[#allocation2 + $0x10] sm:$0xff] }
  0x23   :  { %135 = vmatprep.subr.mxu0 %v50_v41  ;;  %206 = vmatprep.subr.mxu1 %v52_v42  ;;  %v28_v1 = vld [vmem:[%s468_s0] sm:$0x3] }
  0x24   :  { %136 = vmatpush1.msra.mxu0 %v49_v43  ;;  %207 = vmatpush1.msra.mxu1 %v51_v44  ;;  %v93_v6 = vld [vmem:[%s470_s2] sm:$0xf] }
  0x25   :  { %137 = vmatprep.subr.mxu0 %v46_v45  ;;  %208 = vmatprep.subr.mxu1 %v48_v46  ;;  %v98_v9 = vrot.slane %v93_v6, %v97_v4  ;;  %v106_v10 = vrot.slane %v93_v6, %v105_v5  ;;  %v102_v13 = vrot.slane %v93_v6, %v101_v7 }
  0x26   :  { %138 = vmatpush1.msra.mxu0 %v45_v47  ;;  %209 = vmatpush1.msra.mxu1 %v47_v48  ;;  %v110_v14 = vrot.slane %v93_v6, %v109_v8 }
  0x27   :  { %139 = vmatprep.subr.mxu0 %v42_v49  ;;  %210 = vmatprep.subr.mxu1 %v44_v50 }
  0x28   :  { %140 = vmatpush1.msra.mxu0 %v41_v51  ;;  %211 = vmatpush1.msra.mxu1 %v43_v52 }
  0x29   :  { %141 = vmatprep.subr.mxu0 %v38_v53  ;;  %212 = vmatprep.subr.mxu1 %v40_v54 }
  0x2a   :  { %142 = vmatpush1.msra.mxu0 %v37_v55  ;;  %213 = vmatpush1.msra.mxu1 %v39_v56 }
  0x2b   :  { %143 = vmatprep.subr.mxu0 %v34_v57  ;;  %214 = vmatprep.subr.mxu1 %v36_v58 }
  0x2c   :  { %144 = vmatpush1.msra.mxu0 %v33_v59  ;;  %215 = vmatpush1.msra.mxu1 %v35_v60 }
  0x2d   :  { %145 = vmatprep.subr.mxu0 %v30_v61  ;;  %216 = vmatprep.subr.mxu1 %v32_v62 }
  0x2e   :  { %146 = vmatpush1.msra.mxu0 %v29_v63  ;;  %217 = vmatpush1.msra.mxu1 %v31_v0 }
  0x2f   :  { %180 = vmatmul.mubr.f32.vlgmr.msra.gmra.mxu0 %v28_v1  ;;  %251 = vmatmul.mubr.f32.vlgmr.msra.gmra.mxu1 %v28_v1 }
  0xef   :  { %v181_v11 = vpop.f32.mrf.mxu0  ;;  %v252_v12 = vpop.f32.mrf.mxu1 }
  0xf0   :  { %v444_v15 = vadd.f32 %v181_v11, %v98_v9  ;;  %v446_v16 = vadd.f32 %v252_v12, %v106_v10 }
  0xf1   :  { %v183_v17 = vpop.f32.mrf.mxu0  ;;  %v254_v18 = vpop.f32.mrf.mxu1 }
  0xf2   :  { %v261_v19 = vand.u32 2147483647, %v444_v15  ;;  %v263_v20 = vand.u32 2147483647, %v446_v16  ;;  %v450_v21 = vadd.f32 %v183_v17, %v102_v13  ;;  %v452_v22 = vadd.f32 %v254_v18, %v110_v14 }
  0xf3   :  { %v257_v50 = vmax.f32 %v444_v15, 0.0  ;;  %v259_v62 = vmax.f32 %v446_v16, 0.0  ;;  %v408_v14 = vmov 1983009808  }
  0xf4   :  { %v265_v23 = vsub.f32 0.0, %v261_v19  ;;  %v267_v24 = vsub.f32 0.0, %v263_v20  ;;  %v262_v25 = vand.u32 2147483647, %v450_v21  ;;  %v264_v26 = vand.u32 2147483647, %v452_v22 }
  0xf5   :  { %v258_v63 = vmax.f32 %v450_v21, 0.0  ;;  %v260_v10 = vmax.f32 %v452_v22, 0.0  ;;  %v332_v17 = vunpack.c.l.s4 %v408_v14 }
  0xf6   :  { %v269_v27 = vmul.f32 1.442695, %v265_v23  ;;  %v273_v28 = vmul.f32 1.442695, %v267_v24  ;;  %v266_v29 = vsub.f32 0.0, %v262_v25  ;;  %v268_v30 = vsub.f32 0.0, %v264_v26 }
  0xf7   :  { %v333_v18 = vunpack.c.0.s8 %v332_v17 }
  0xf8   :  { %358 = vpow2.f32 %v269_v27  ;;  %v271_v31 = vmul.f32 1.442695, %v266_v29  ;;  %v275_v32 = vmul.f32 1.442695, %v268_v30 }
  0xf9   :  { %360 = vpow2.f32 %v273_v28  ;;  %v336_v27 = vsub.s32 %v333_v18, %v435_v3 }
  0xfa   :  { %362 = vpow2.f32 %v271_v31 }
  0xfb   :  { %364 = vpow2.f32 %v275_v32 }
 0x105   :  { %v359_v33 = vpop.eup %358 }
 0x106   :  { %v361_v34 = vpop.eup %360  ;;  %v277_v35 = vadd.f32 1.0, %v359_v33  ;;  %v280_v41 = vmul.f32 -0.5, %v359_v33  ;;  %v283_v46 = vand.u32 2147483647, %v359_v33 }
 0x107   :  { %v295_v36 = vadd.f32 1.0, %v361_v34  ;;  %v363_v37 = vpop.eup %362  ;;  %v298_v42 = vmul.f32 -0.5, %v361_v34  ;;  %v301_v48 = vand.u32 2147483647, %v361_v34 }
 0x108   :  { %366 = vlog2.f32 %v277_v35  ;;  %v365_v38 = vpop.eup %364  ;;  %v286_v39 = vadd.f32 1.0, %v363_v37  ;;  %v289_v43 = vmul.f32 -0.5, %v363_v37  ;;  %v281_v44 = vadd.f32 1.0, %v280_v41 }
 0x109   :  { %368 = vlog2.f32 %v295_v36  ;;  %v304_v40 = vadd.f32 1.0, %v365_v38  ;;  %v307_v45 = vmul.f32 -0.5, %v365_v38  ;;  %v299_v47 = vadd.f32 1.0, %v298_v42 }
 0x10a   :  { %370 = vlog2.f32 %v286_v39  ;;  %v290_v51 = vadd.f32 1.0, %v289_v43  ;;  %v282_v54 = vmul.f32 %v359_v33, %v281_v44  ;;  %v292_v55 = vand.u32 2147483647, %v363_v37 }
 0x10b   :  { %372 = vlog2.f32 %v304_v40  ;;  %v308_v56 = vadd.f32 1.0, %v307_v45  ;;  %vm284_vm0 = vcmp.lt.f32.partialorder %v283_v46, 0.0004427343  ;;  %v300_v58 = vmul.f32 %v361_v34, %v299_v47 }
 0x10c   :  { %v310_v59 = vand.u32 2147483647, %v365_v38  ;;  %vm302_vm1 = vcmp.lt.f32.partialorder %v301_v48, 0.0004427343  ;;  %v291_v5 = vmul.f32 %v363_v37, %v290_v51  ;;  %vm293_vm2 = vcmp.lt.f32.partialorder %v292_v55, 0.0004427343 }
 0x10d   :  { %v309_v8 = vmul.f32 %v365_v38, %v308_v56 }
 0x10e   :  { %vm311_vm3 = vcmp.lt.f32.partialorder %v310_v59, 0.0004427343 }
 0x115   :  { %v367_v49 = vpop.eup %366 }
 0x116   :  { %v369_v52 = vpop.eup %368  ;;  %v279_v53 = vmul.f32 0.6931472, %v367_v49 }
 0x117   :  { %v297_v57 = vmul.f32 0.6931472, %v369_v52  ;;  %v371_v60 = vpop.eup %370 }
 0x118   :  { %v285_v61 = vsel %vm284_vm0, %v282_v54, %v279_v53  ;;  %v373_v0 = vpop.eup %372  ;;  %v288_v4 = vmul.f32 0.6931472, %v371_v60 }
 0x119   :  { %v313_v1 = vadd.f32 %v285_v61, %v257_v50  ;;  %v303_v2 = vsel %vm302_vm1, %v300_v58, %v297_v57  ;;  %v306_v7 = vmul.f32 0.6931472, %v373_v0 }
 0x11a   :  { %v315_v6 = vadd.f32 %v303_v2, %v259_v62  ;;  %v294_v9 = vsel %vm293_vm2, %v291_v5, %v288_v4 }
 0x11b   :  { %374 = vtanh.f32 %v313_v1  ;;  %v314_v11 = vadd.f32 %v294_v9, %v258_v63  ;;  %v312_v12 = vsel %vm311_vm3, %v309_v8, %v306_v7 }
 0x11c   :  { %376 = vtanh.f32 %v315_v6  ;;  %v316_v13 = vadd.f32 %v312_v12, %v260_v10 }
 0x11d   :  { %378 = vtanh.f32 %v314_v11 }
 0x11e   :  { %380 = vtanh.f32 %v316_v13 }
 0x128   :  { %v375_v19 = vpop.eup %374 }
 0x129   :  { %v377_v20 = vpop.eup %376  ;;  %v321_v25 = vmul.f32 %v375_v19, %v444_v15 }
 0x12a   :  { %v379_v23 = vpop.eup %378  ;;  %v323_v28 = vmul.f32 %v377_v20, %v446_v16 }
 0x12b   :  { %v381_v24 = vpop.eup %380  ;;  %v322_v26 = vmul.f32 %v379_v23, %v450_v21 }
 0x12c   :  { %v324_v29 = vmul.f32 %v381_v24, %v452_v22 }
 0x12d   :  { %v329_v30 = vcombine.low %v321_v25, %v322_v26 }
 0x12e   :  { %v330_v31 = vcombine.low %v323_v28, %v324_v29 }
 0x12f   :  { %v337_v32 = vrot.slane %v329_v30, %v336_v27 }
 0x130   :  { %v344_v33 = vrot.slane %v330_v31, %v336_v27 }
 0x132   :  { %v345_v34 = vcombine.low %v337_v32, %v344_v33 }
 0x134   :  { %347 = vst [vmem:[%s471_s3] sm:$0xff] %v345_v34 }
 0x135   :  { %352 = vsyncpa [#allocation3], 1 }

// kernel: fwd.5
= control target key start
LH: loop header
LB: loop body
LE: loop exit
PB: predicated region body
PF: predicated region fallthrough
CT: control target
= control target key end

     0   :  { %s3348_s0 = inlined_call_operand.vmem [shape: s32[4], index: 0, kind: input, shape index: {}]   ;;  %s3349_s1 = inlined_call_operand.vmem [shape: bf16[2,64,8], index: 1, kind: input, shape index: {}]   ;;  %s3350_s2 = inlined_call_operand.vmem [shape: bf16[2,64,128], index: 2, kind: input, shape index: {}]   ;;  %s3351_s3 = inlined_call_operand.vmem [shape: f32[8,1,128], index: 3, kind: input, shape index: {}]   ;;  %s3352_s4 = inlined_call_operand.vmem [shape: bf16[8,128], index: 4, kind: input, shape index: {}]   ;;  %s3353_s5 = inlined_call_operand.vmem [shape: f32[1,128], index: 5, kind: input, shape index: {}]   ;;  %s3354_s6 = inlined_call_operand.hbm [shape: bf16[4,512,256], index: 6, kind: input, shape index: {}]   ;;  %s3355_s7 = inlined_call_operand.vmem [shape: f32[4,1,256], index: 7, kind: input, shape index: {}]   ;;  %s3356_s8 = inlined_call_operand.vmem [shape: bf16[4,128,256], index: 8, kind: input, shape index: {}]   ;;  %s3357_s9 = inlined_call_operand.vmem [shape: f32[4,1,256], index: 9, kind: input, shape index: {}]   ;;  %s3358_s10 = inlined_call_operand.vmem [shape: bf16[128,128], index: 10, kind: input, shape index: {}]   ;;  %s3359_s11 = inlined_call_operand.vmem [shape: f32[1,128], index: 11, kind: input, shape index: {}]   ;;  %s3360_s12 = inlined_call_operand.vmem [shape: bf16[128,8], index: 12, kind: input, shape index: {}]   ;;  %s3361_s13 = inlined_call_operand.vmem [shape: f32[1,8], index: 13, kind: input, shape index: {}]   ;;  %s3362_s14 = inlined_call_operand.vmem [shape: f32[2,64,8], index: 14, kind: output, shape index: {}]  }
   0x1   :  { %3369 = sst [smem:[#allocation17_spill]] %s3349_s1  ;;  %s19_s15 = sshll.u32 %s3348_s0, 4  ;;  %s20_s15 = int_to_ptr.vmem [resolvable:$true] %s19_s15 }
   0x2   :  { %3370 = sst [smem:[#allocation18_spill]] %s3350_s2  ;;  %s2695_s16 = scalar_lea.vmem %s20_s15, 16 }
   0x3   :  { %3371 = sst [smem:[#allocation19_spill]] %s3354_s6  ;;  %p2696_p0 = scmp.ne.s32.totalorder %s20_s15, %s2695_s16 }
   0x4   :  { %3372 = sst [smem:[#allocation20_spill]] %s3358_s10  ;;  %p2700_p1 = scmp.lt.s32.totalorder %s20_s15, %s20_s15 }
   0x5   :  { %3373 = sst [smem:[#allocation21_spill]] %s3359_s11  ;;  %p2701_p2 = scmp.lt.s32.totalorder %s2695_s16, %s2695_s16 }
   0x6   :  { %3374 = sst [smem:[#allocation22_spill]] %s3360_s12 }
   0x7   :  { %3375 = sst [smem:[#allocation23_spill]] %s3361_s13  ;;  %p2702_p3 = por %p2701_p2, %p2700_p1 }
   0x9   :  { %p2703_p4 = pnand %p2702_p3, %p2696_p0 }
   0xb   :  { %2706 = shalt.err (!%p2703_p4)  }
   0xc   :  { %s2805_s17 = smov [#allocation6]  }
   0xd   :  { %22 = dma.vmem_to_smem %s20_s15, 16, %s2805_s17, [#allocation5] }
   0xe   :  { %2767 = dma.done.wait [#allocation5], 16 }
   0xf   :  { %2768 = vsyncadd [#allocation5], 4294967280 }
  0x10   :  { %24 = sfence }
  0x11   :  { %25 = vsyncpa [#allocation8], 0 }
  0x12   :  { %27 = vsyncpa [#allocation8 + $0x1], 0  ;;  %s2889_s18 = smov 0   ;;  %s2891_s19 = smov 0  }
  0x13   :  { %s2893_s0 = smov 0   ;;  %s2895_s20 = smov 0  }
  0x14   :  { %s2897_s21 = smov 0   ;;  %s2899_s22 = smov 0  }
  0x15   :  { %s2901_s23 = smov 0   ;;  %s2903_s24 = smov 0  }
  0x16 LB: > { %3376 = sst [smem:[#allocation11_spill]] %s2783_s0  ;;  %s2161_s25 = sadd.s32 4294967295, %s2803_s24   ;;  %s2803_s24 = sphi %s2903_s24, %s33_s24   ;;  %s2799_s23 = sphi %s2901_s23, %s3397_s23   ;;  %s2795_s22 = sphi %s2899_s22, %s3396_s22   ;;  %s2791_s21 = sphi %s2897_s21, %s3395_s21   ;;  %s2787_s20 = sphi %s2895_s20, %s3394_s20   ;;  %s2783_s0 = sphi %s2893_s0, %s3393_s0   ;;  %s2779_s19 = sphi %s2891_s19, %s3399_s19   ;;  %s2775_s18 = sphi %s2889_s18, %s3398_s18  }
  0x17   : > { %3377 = sst [smem:[#allocation12_spill]] %s2795_s22  ;;  %s42_s26 = sadd.s32 1, %s2795_s22 }
  0x18   : > { %3378 = sst [smem:[#allocation13_spill]] %s2799_s23  ;;  %p43_p5 = scmp.ge.s32.totalorder %s42_s26, 4 }
  0x19   : > { %s45_s27 = sadd.s32 1, %s2799_s23  ;;  %s176_s28 = sadd.s32 1, %s2783_s0 }
  0x1a   : > { %p183_p6 = scmp.ne.s32.totalorder %s2783_s0, %s2779_s19  ;;  %s3401_s26 = smov (%p43_p5, %s42_s26), 0 }
  0x1b   : > { %3379 = sst [smem:[#allocation14_spill]] %s3401_s26  ;;  %s3403_s27 = smov (!%p43_p5, %s45_s27), %s2799_s23 }
  0x1c   : > { %s173_s29 = ssub.s32 %s2795_s22, %s3401_s26  ;;  %p184_p7 = scmp.eq.s32.totalorder %s2803_s24, 0 }
  0x1d   : > { %p47_p8 = scmp.ge.s32.totalorder %s3403_s27, 2  ;;  %p174_p9 = scmp.eq.s32.totalorder %s173_s29, 0 }
  0x1e   : > { %p2939_p10 = por %p184_p7, %p183_p6  ;;  %p189_p11 = scmp.ne.s32.totalorder %s2779_s19, %s2775_s18 }
  0x1f   : > { %s3405_s27 = smov (%p47_p8, %s3403_s27), 0  ;;  %p190_p12 = scmp.eq.s32.totalorder %s2161_s25, 0 }
  0x20   : > { %3381 = sst [smem:[#allocation15_spill]] %s3405_s27  ;;  %p2433_p13 = scmp.lt.s32.totalorder %s2803_s24, 8 }
  0x21   : > { %s2947_s15 = scalar_select %p174_p9, %s2783_s0, %s176_s28  }
  0x22   : > { %s445_s16 = sand.u32 1, %s2783_s0   ;;  %p2951_p0 = por %p190_p12, %p189_p11 }
  0x23   : > { %3382 = sst [smem:[#allocation16_spill]] %s2947_s15  ;;  %s2167_s26 = sshll.u32 %s445_s16, 9 }
  0x24   : > { %s2315_s23 = sshll.u32 %s2795_s22, 13  ;;  %s3384_s6 = sld [smem:[#allocation19_spill]] }
  0x25   : > { %s449_s12 = scalar_lea.vmem [#allocation7], %s2167_s26  ;;  %p2961_p1 = pnand %p2433_p13, %p2939_p10 }
  0x26   : > { %s456_s10 = sshll.u32 %s449_s12, 4  ;;  %s446_s25 = scalar_lea.sflag [#allocation8], %s445_s16  ;;  %s457_s10 = int_to_ptr.vmem [resolvable:$true] %s456_s10 }
  0x27   : > { %p2709_p2 = pneg %p2961_p1  ;;  %s2720_s28 = scalar_lea.vmem %s457_s10, 8192 }
  0x28   : > { %p2721_p3 = scmp.ne.s32.totalorder %s457_s10, %s2720_s28  ;;  %s2806_s27 = smov [#allocation7]  }
  0x29   : > { %s2725_s22 = sshll.u32 %s2806_s27, 4  ;;  %s2726_s22 = int_to_ptr.vmem [resolvable:$false] %s2725_s22 }
  0x2a   : > { %s455_s11 = scalar_lea.hbm %s3384_s6, %s2315_s23  ;;  %p2723_p4 = pnand %p2721_p3, %p2709_p2 }
  0x2b   : > { %s2727_s13 = scalar_lea.vmem %s2726_s22, 16384  ;;  %p2728_p6 = scmp.lt.s32.totalorder %s457_s10, %s2726_s22 }
  0x2c   : > { %p2724_p5 = pneg %p2723_p4  ;;  %p2729_p7 = scmp.lt.s32.totalorder %s2727_s13, %s2720_s28 }
  0x2e   : > { %p2730_p8 = por %p2729_p7, %p2728_p6 }
  0x30   : > { %p2731_p9 = pnand %p2730_p8, %p2724_p5 }
  0x32   : > { %2734 = shalt.err (!%p2731_p9)
}
  0x33   : > { %s2807_s12 = smov 128   ;;  %s2808_s23 = smov 8  }
  0x34   : > { %2432 = dma.hbm_to_vmem [thread:$0]  (!%p2961_p1), %s455_s11, 8192, %s457_s10, %s446_s25, %s2807_s12, %s2807_s12, %s2808_s23  }
  0x35   : > { %p2170_p10 = scmp.ge.s32.totalorder %s2803_s24, 1  ;;  %p486_p11 = scmp.lt.s32.totalorder %s2803_s24, 9 }
  0x37   : > { %p487_p12 = pnand %p2170_p10, %p486_p11 }
  0x38   : > { %s492_s26 = sand.u32 (!%p487_p12), 1, %s2779_s19  }
  0x39   : > { %490 = sbr.rel (%p487_p12) target bundleno = 1266 (0x4f2), region = 72  ;;  %s2171_s27 = sshll.u32 (!%p487_p12), %s492_s26, 9 }
  0x3a   : > { %s493_s22 = scalar_lea.sflag (!%p487_p12), [#allocation8], %s492_s26  ;;  %s2972_s30 = scalar_lea.vmem (!%p487_p12), [#allocation7], %s2171_s27 }
  0x3e   : > { %2770 = dma.done.wait (%p2951_p0), %s493_s22, 8192  }
  0x3f   : > { %2772 = vsyncadd (%p2951_p0), %s493_s22, 4294959104  ;;  %p567_p13 = scmp.lt.s32.totalorder %s2791_s21, 1  ;;  %s2176_s10 = sshll.u32 %s2791_s21, 2 }
  0x40   : > { %s578_s11 = sadd.s32 %s2787_s20, %s2176_s10  ;;  %p584_p2 = scmp.lt.s32.totalorder %s2787_s20, 3 }
  0x41   : > { %s3407_s21 = smov (!%p567_p13, %s2791_s21), 1  ;;  %p579_p1 = scmp.lt.s32.totalorder %s578_s11, 7 }
  0x42   : > { %s2316_s16 = sshll.u32 %s3407_s21, 5  ;;  %s2319_s29 = sshll.u32 %s3407_s21, 6 }
  0x43   : > { %s3386_s1 = sld [smem:[#allocation17_spill]]  ;;  %s3409_s11 = smov (!%p579_p1, %s578_s11), 7 }
  0x44   : > { %s3387_s2 = sld [smem:[#allocation18_spill]]  ;;  %s581_s22 = scalar_lea.vmem %s3351_s3, %s3409_s11 }
  0x45   : > { %s585_s23 = scalar_select %p584_p2, %s2787_s20, 3 }
  0x46   : > { %s3001_s21 = scalar_lea.vmem %s3362_s14, %s2319_s29  ;;  %p2183_p0 = scmp.ne.s32.totalorder %s2787_s20, 0 }
  0x47   : > { %s2177_s18 = sshll.u32 %s585_s23, 1  ;;  %s2318_s25 = sshll.u32 %s585_s23, 7 }
  0x48   : > { %s3016_s27 = scalar_lea.vmem %s3357_s9, %s2177_s18  ;;  %606 = sbr.rel (%p2183_p0) target bundleno = 286 (0x11e), region = 80 }
  0x49   : > { %s571_s28 = scalar_lea.vmem %s3386_s1, %s2316_s16 }
  0x4a   : > { %s2989_s12 = scalar_lea.vmem %s3387_s2, %s2316_s16  ;;  %s3006_s16 = scalar_lea.vmem %s3355_s7, %s2177_s18 }
  0x4b   : > { %s3011_s2 = scalar_lea.vmem %s3356_s8, %s2318_s25 }
  0x4d   : > { %v615_v0 = vld [vmem:[%s3352_s4] sm:$0xf]  ;;  %vm656_vm0 = vcmask 1043456   ;;  %vm643_vm1 = vcmask 64512   ;;  %v2504_v3 = vld [vmem:[%s571_s28 + $0x10] sm:$0xff]   ;;  %v2505_v4 = vld [vmem:[%s571_s28 + $0x8] sm:$0xff]  }
  0x4e   : > { %v2503_v1 = vld [vmem:[%s571_s28] sm:$0xff]   ;;  %2425 = vmatprep.subr.msk.bf16.mxu0 %vm656_vm0, %v615_v0  ;;  %2426 = vmatprep.subr.msk.bf16.mxu1 %vm656_vm0, %v615_v0  ;;  %v658_v2 = vsel %vm656_vm0, %v615_v0, 0  ;;  %v2506_v5 = vld [vmem:[%s571_s28 + $0x18] sm:$0xff]   ;;  %v2809_v6 = vmov 0.0  }
  0x4f   : > { %2350 = vmatpush3.bf16.msra.mxu0 %v658_v2  ;;  %2408 = vmatpush3.bf16.msra.mxu1 %v658_v2  ;;  %741 = vst [vmem:[#allocation3] sm:$0xff] %v2809_v6  ;;  %742 = vst [vmem:[#allocation3 + $0x18] sm:$0xff] %v2809_v6  ;;  %v2184_v7 = vld [vmem:[%s3353_s5] ss:$0 sm:$0xff] }
  0x50   : > { %2351 = vmatprep.mubr.msk.bf16.mxu0 %vm643_vm1, %v2503_v1  ;;  %2355 = vmatprep.mubr.msk.bf16.mxu1 %vm643_vm1, %v2504_v3  ;;  %743 = vst [vmem:[#allocation3 + $0x10] sm:$0xff] %v2809_v6  ;;  %744 = vst [vmem:[#allocation3 + $0x20] sm:$0xff] %v2809_v6 }
  0x51   : > { %745 = vst [vmem:[#allocation3 + $0x28] sm:$0xff] %v2809_v6  ;;  %746 = vst [vmem:[#allocation3 + $0x8] sm:$0xff] %v2809_v6 }
  0x52   : > { %2352 = vmatmul.mubr.msk.bf16.vlgmr.msra.gmra.mxu0 %vm643_vm1, %v2505_v4  ;;  %2356 = vmatmul.mubr.msk.bf16.vlgmr.msra.gmra.mxu1 %vm643_vm1, %v2506_v5  ;;  %747 = vst [vmem:[#allocation3 + $0x30] sm:$0xff] %v2809_v6  ;;  %748 = vst [vmem:[#allocation3 + $0x38] sm:$0xff] %v2809_v6 }
  0x53   : > { %749 = vst [vmem:[#allocation4] sm:$0xff] %v2809_v6  ;;  %750 = vst [vmem:[#allocation4 + $0x8] sm:$0xff] %v2809_v6 }
  0x54   : > { %751 = vst [vmem:[#allocation4 + $0x10] sm:$0xff] %v2809_v6  ;;  %752 = vst [vmem:[#allocation4 + $0x18] sm:$0xff] %v2809_v6 }
  0x55   : > { %753 = vst [vmem:[#allocation4 + $0x20] sm:$0xff] %v2809_v6  ;;  %754 = vst [vmem:[#allocation4 + $0x28] sm:$0xff] %v2809_v6 }
  0x56   : > { %755 = vst [vmem:[#allocation4 + $0x30] sm:$0xff] %v2809_v6  ;;  %756 = vst [vmem:[#allocation4 + $0x38] sm:$0xff] %v2809_v6 }
  0x57   : > { %757 = vst [vmem:[#allocation4 + $0x40] sm:$0xff] %v2809_v6  ;;  %758 = vst [vmem:[#allocation4 + $0x48] sm:$0xff] %v2809_v6 }
 0x112   : > { %v2353_v8 = vpop.f32.mrf.mxu0  ;;  %v2357_v10 = vpop.f32.mrf.mxu1 }
 0x113   : > { %v703_v9 = vadd.f32 %v2353_v8, %v2184_v7  ;;  %v719_v11 = vadd.f32 %v2357_v10, %v2184_v7 }
 0x114   : > { %v694_v12 = vpop.f32.mrf.mxu0  ;;  %v710_v15 = vpop.f32.mrf.mxu1 }
 0x115   : > { %v727_v13 = vmax.f32 %v703_v9, 0.0  ;;  %v695_v14 = vadd.f32 %v2184_v7, %v694_v12  ;;  %v731_v16 = vmax.f32 %v719_v11, 0.0  ;;  %v711_v17 = vadd.f32 %v2184_v7, %v710_v15 }
 0x116   : > { %v2354_v18 = vpop.f32.mrf.mxu0  ;;  %v2358_v21 = vpop.f32.mrf.mxu1 }
 0x117   : > { %735 = vst [vmem:[#allocation2 + $0x18] sm:$0xff] %v727_v13  ;;  %v725_v19 = vmax.f32 %v695_v14, 0.0  ;;  %v706_v20 = vadd.f32 %v2354_v18, %v2184_v7  ;;  %739 = vst [vmem:[#allocation2 + $0x28] sm:$0xff] %v731_v16  ;;  %v729_v22 = vmax.f32 %v711_v17, 0.0  ;;  %v722_v23 = vadd.f32 %v2358_v21, %v2184_v7 }
 0x118   : > { %v697_v24 = vpop.f32.mrf.mxu0  ;;  %v713_v27 = vpop.f32.mrf.mxu1 }
 0x119   : > { %733 = vst [vmem:[#allocation2 + $0x30] sm:$0xff] %v725_v19  ;;  %v728_v25 = vmax.f32 %v706_v20, 0.0  ;;  %v698_v26 = vadd.f32 %v2184_v7, %v697_v24  ;;  %737 = vst [vmem:[#allocation2 + $0x8] sm:$0xff] %v729_v22  ;;  %v732_v28 = vmax.f32 %v722_v23, 0.0  ;;  %v714_v29 = vadd.f32 %v2184_v7, %v713_v27 }
 0x11b   : > { %736 = vst [vmem:[#allocation2 + $0x10] sm:$0xff] %v728_v25  ;;  %v726_v30 = vmax.f32 %v698_v26, 0.0  ;;  %740 = vst [vmem:[#allocation2 + $0x38] sm:$0xff] %v732_v28  ;;  %v730_v31 = vmax.f32 %v714_v29, 0.0 }
 0x11d   : > { %734 = vst [vmem:[#allocation2] sm:$0xff] %v726_v30  ;;  %738 = vst [vmem:[#allocation2 + $0x20] sm:$0xff] %v730_v31 }
 0x11e PF: > { %v2507_v32 = vld [vmem:[%s2972_s30 + $0x74] ss:$8 sps:$4 sm:$0xff]   ;;  %v2511_v34 = vld [vmem:[%s2972_s30 + $0x70] ss:$8 sps:$4 sm:$0xff]   ;;  %v2513_v36 = vld [vmem:[%s2972_s30 + $0x64] ss:$8 sps:$4 sm:$0xff]  }
 0x11f   : > { %v2509_v33 = vld [vmem:[%s2972_s30 + $0x174] ss:$8 sps:$4 sm:$0xff]   ;;  %1251 = vmatprep.subr.bf16.mxu0 %v2507_v32  ;;  %v2512_v35 = vld [vmem:[%s2972_s30 + $0x170] ss:$8 sps:$4 sm:$0xff]   ;;  %v2515_v37 = vld [vmem:[%s2972_s30 + $0x164] ss:$8 sps:$4 sm:$0xff]  }
 0x120   : > { %1324 = vmatprep.subr.bf16.mxu1 %v2509_v33  ;;  %1252 = vmatpush1.bf16.msra.mxu0 %v2511_v34  ;;  %v2517_v38 = vld [vmem:[%s2972_s30 + $0x60] ss:$8 sps:$4 sm:$0xff]   ;;  %v2519_v40 = vld [vmem:[%s2972_s30 + $0x54] ss:$8 sps:$4 sm:$0xff]   ;;  %v2523_v42 = vld [vmem:[%s2972_s30 + $0x50] ss:$8 sps:$4 sm:$0xff]  }
 0x121   : > { %1325 = vmatpush1.bf16.msra.mxu1 %v2512_v35  ;;  %1253 = vmatprep.subr.bf16.mxu0 %v2513_v36  ;;  %v2518_v39 = vld [vmem:[%s2972_s30 + $0x160] ss:$8 sps:$4 sm:$0xff]   ;;  %v2521_v41 = vld [vmem:[%s2972_s30 + $0x154] ss:$8 sps:$4 sm:$0xff]   ;;  %v2524_v43 = vld [vmem:[%s2972_s30 + $0x150] ss:$8 sps:$4 sm:$0xff]  }
 0x122   : > { %1326 = vmatprep.subr.bf16.mxu1 %v2515_v37  ;;  %v2525_v44 = vld [vmem:[%s2972_s30 + $0x44] ss:$8 sps:$4 sm:$0xff]   ;;  %v2529_v46 = vld [vmem:[%s2972_s30 + $0x40] ss:$8 sps:$4 sm:$0xff]   ;;  %v2531_v48 = vld [vmem:[%s2972_s30 + $0x34] ss:$8 sps:$4 sm:$0xff]  }
 0x123   : > { %v2527_v45 = vld [vmem:[%s2972_s30 + $0x144] ss:$8 sps:$4 sm:$0xff]   ;;  %v2530_v47 = vld [vmem:[%s2972_s30 + $0x140] ss:$8 sps:$4 sm:$0xff]   ;;  %v2533_v49 = vld [vmem:[%s2972_s30 + $0x134] ss:$8 sps:$4 sm:$0xff]  }
 0x124   : > { %1254 = vmatpush1.bf16.msra.mxu0 %v2517_v38  ;;  %v2535_v50 = vld [vmem:[%s2972_s30 + $0x30] ss:$8 sps:$4 sm:$0xff]   ;;  %v2537_v52 = vld [vmem:[%s2972_s30 + $0x24] ss:$8 sps:$4 sm:$0xff]   ;;  %v2541_v54 = vld [vmem:[%s2972_s30 + $0x20] ss:$8 sps:$4 sm:$0xff]  }
 0x125   : > { %1327 = vmatpush1.bf16.msra.mxu1 %v2518_v39  ;;  %1255 = vmatprep.subr.bf16.mxu0 %v2519_v40  ;;  %v2536_v51 = vld [vmem:[%s2972_s30 + $0x130] ss:$8 sps:$4 sm:$0xff]   ;;  %v2539_v53 = vld [vmem:[%s2972_s30 + $0x124] ss:$8 sps:$4 sm:$0xff]   ;;  %v2542_v55 = vld [vmem:[%s2972_s30 + $0x120] ss:$8 sps:$4 sm:$0xff]  }
 0x126   : > { %1328 = vmatprep.subr.bf16.mxu1 %v2521_v41  ;;  %v2543_v56 = vld [vmem:[%s2972_s30 + $0x14] ss:$8 sps:$4 sm:$0xff]   ;;  %v2547_v58 = vld [vmem:[%s2972_s30 + $0x10] ss:$8 sps:$4 sm:$0xff]   ;;  %v2549_v60 = vld [vmem:[%s2972_s30 + $0x4] ss:$8 sps:$4 sm:$0xff]  }
 0x127   : > { %v2545_v57 = vld [vmem:[%s2972_s30 + $0x114] ss:$8 sps:$4 sm:$0xff]   ;;  %v2548_v59 = vld [vmem:[%s2972_s30 + $0x110] ss:$8 sps:$4 sm:$0xff]   ;;  %v2551_v61 = vld [vmem:[%s2972_s30 + $0x104] ss:$8 sps:$4 sm:$0xff]  }
 0x128   : > { %1256 = vmatpush1.bf16.msra.mxu0 %v2523_v42  ;;  %v2553_v62 = vld [vmem:[%s2972_s30] ss:$8 sps:$4 sm:$0xff]   ;;  %v2555_v0 = vld [vmem:[%s2972_s30 + $0xf4] ss:$8 sps:$4 sm:$0xff]   ;;  %v2559_v2 = vld [vmem:[%s2972_s30 + $0xf0] ss:$8 sps:$4 sm:$0xff]  }
 0x129   : > { %1329 = vmatpush1.bf16.msra.mxu1 %v2524_v43  ;;  %1257 = vmatprep.subr.bf16.mxu0 %v2525_v44  ;;  %v2554_v63 = vld [vmem:[%s2972_s30 + $0x100] ss:$8 sps:$4 sm:$0xff]   ;;  %v2557_v1 = vld [vmem:[%s2972_s30 + $0x1f4] ss:$8 sps:$4 sm:$0xff]   ;;  %v2560_v3 = vld [vmem:[%s2972_s30 + $0x1f0] ss:$8 sps:$4 sm:$0xff]  }
 0x12a   : > { %1330 = vmatprep.subr.bf16.mxu1 %v2527_v45  ;;  %v2561_v4 = vld [vmem:[%s2972_s30 + $0xe4] ss:$8 sps:$4 sm:$0xff]   ;;  %v2565_v6 = vld [vmem:[%s2972_s30 + $0xe0] ss:$8 sps:$4 sm:$0xff]   ;;  %v2567_v8 = vld [vmem:[%s2972_s30 + $0xd4] ss:$8 sps:$4 sm:$0xff]  }
 0x12b   : > { %v2563_v5 = vld [vmem:[%s2972_s30 + $0x1e4] ss:$8 sps:$4 sm:$0xff]   ;;  %v2566_v7 = vld [vmem:[%s2972_s30 + $0x1e0] ss:$8 sps:$4 sm:$0xff]   ;;  %v2569_v9 = vld [vmem:[%s2972_s30 + $0x1d4] ss:$8 sps:$4 sm:$0xff]  }
 0x12c   : > { %1258 = vmatpush1.bf16.msra.mxu0 %v2529_v46  ;;  %v2571_v10 = vld [vmem:[%s2972_s30 + $0xd0] ss:$8 sps:$4 sm:$0xff]   ;;  %v2573_v12 = vld [vmem:[%s2972_s30 + $0xc4] ss:$8 sps:$4 sm:$0xff]   ;;  %v2577_v14 = vld [vmem:[%s2972_s30 + $0xc0] ss:$8 sps:$4 sm:$0xff]  }
 0x12d   : > { %1331 = vmatpush1.bf16.msra.mxu1 %v2530_v47  ;;  %1259 = vmatprep.subr.bf16.mxu0 %v2531_v48  ;;  %v2572_v11 = vld [vmem:[%s2972_s30 + $0x1d0] ss:$8 sps:$4 sm:$0xff]   ;;  %v2575_v13 = vld [vmem:[%s2972_s30 + $0x1c4] ss:$8 sps:$4 sm:$0xff]   ;;  %v2578_v15 = vld [vmem:[%s2972_s30 + $0x1c0] ss:$8 sps:$4 sm:$0xff]  }
 0x12e   : > { %1332 = vmatprep.subr.bf16.mxu1 %v2533_v49  ;;  %v3073_v16 = vld [vmem:[#allocation2 + $0x30] sm:$0xff]  ;;  %v2579_v17 = vld [vmem:[%s2972_s30 + $0xb4] ss:$8 sps:$4 sm:$0xff]   ;;  %v3079_v20 = vld [vmem:[#allocation2 + $0x18] sm:$0xff]  ;;  %s3097_s23 = sld [smem:[#allocation6 + %s2787_s20]]  ;;  %p2294_p3 = scmp.ne.s32.totalorder %s2787_s20, 3 }
 0x12f   : > { %v2581_v18 = vld [vmem:[%s2972_s30 + $0x1b4] ss:$8 sps:$4 sm:$0xff]   ;;  %v3081_v21 = vld [vmem:[#allocation2 + $0x10] sm:$0xff]  ;;  %v3089_v25 = vld [vmem:[#allocation2 + $0x38] sm:$0xff]  ;;  %s3389_s6 = sld [smem:[#allocation22_spill]] (!%p2294_p3) }
 0x130   : > { %1260 = vmatpush1.bf16.msra.mxu0 %v2535_v50  ;;  %v3077_v19 = vld [vmem:[#allocation2] sm:$0xff]  ;;  %v3083_v22 = vld [vmem:[#allocation2 + $0x8] sm:$0xff]  ;;  %v2585_v39 = vld [vmem:[%s2972_s30 + $0xa4] ss:$8 sps:$4 sm:$0xff]  }
 0x131   : > { %1333 = vmatpush1.bf16.msra.mxu1 %v2536_v51  ;;  %1261 = vmatprep.subr.bf16.mxu0 %v2537_v52  ;;  %v3085_v23 = vld [vmem:[#allocation2 + $0x20] sm:$0xff]  ;;  %v3087_v24 = vld [vmem:[#allocation2 + $0x28] sm:$0xff]  ;;  %v2587_v40 = vld [vmem:[%s2972_s30 + $0x1a4] ss:$8 sps:$4 sm:$0xff]  }
 0x132   : > { %1334 = vmatprep.subr.bf16.mxu1 %v2539_v53  ;;  %v2193_v26 = vld [vmem:[%s581_s22] ss:$0 sm:$0xff]  ;;  %v2589_v41 = vld [vmem:[%s2972_s30 + $0xa0] ss:$8 sps:$4 sm:$0xff]   ;;  %v2591_v43 = vld [vmem:[%s2972_s30 + $0x94] ss:$8 sps:$4 sm:$0xff]  }
 0x133   : > { %v774_v27 = vadd.f32 %v2193_v26, %v3073_v16  ;;  %v775_v28 = vadd.f32 %v2193_v26, %v3077_v19  ;;  %v3102_v29 = vadd.f32 %v2193_v26, %v3079_v20  ;;  %v3105_v30 = vadd.f32 %v2193_v26, %v3081_v21  ;;  %v2603_v31 = vld [vmem:[%s2989_s12] sm:$0xff]   ;;  %v2590_v42 = vld [vmem:[%s2972_s30 + $0x1a0] ss:$8 sps:$4 sm:$0xff]   ;;  %v2597_v47 = vld [vmem:[%s2972_s30 + $0x84] ss:$8 sps:$4 sm:$0xff]  }
 0x134   : > { %1262 = vmatpush1.bf16.msra.mxu0 %v2541_v54  ;;  %v2583_v32 = vld [vmem:[%s2972_s30 + $0xb0] ss:$8 sps:$4 sm:$0xff]   ;;  %v3110_v33 = vadd.f32 %v2193_v26, %v3083_v22  ;;  %v3113_v34 = vadd.f32 %v2193_v26, %v3085_v23  ;;  %v3116_v35 = vadd.f32 %v2193_v26, %v3087_v24  ;;  %v3119_v36 = vadd.f32 %v2193_v26, %v3089_v25  ;;  %v2593_v44 = vld [vmem:[%s2972_s30 + $0x194] ss:$8 sps:$4 sm:$0xff]   ;;  %s791_s11 = ssub.s32 8, %s3097_s23  ;;  %s3146_s10 = scalar_lea.vmem [#allocation4], %s3097_s23 }
 0x135   : > { %1335 = vmatpush1.bf16.msra.mxu1 %v2542_v55  ;;  %1263 = vmatprep.subr.bf16.mxu0 %v2543_v56  ;;  %v2584_v37 = vld [vmem:[%s2972_s30 + $0x1b0] ss:$8 sps:$4 sm:$0xff]   ;;  %782 = vst [vmem:[#allocation4 + $0x8] sm:$0xff] %v774_v27  ;;  %783 = vst [vmem:[#allocation4 + $0x10] sm:$0xff] %v775_v28  ;;  %v815_v38 = vpack.c.bf16 %v775_v28, %v774_v27  ;;  %v2599_v48 = vld [vmem:[%s2972_s30 + $0x184] ss:$8 sps:$4 sm:$0xff]  }
 0x136   : > { %1336 = vmatprep.subr.bf16.mxu1 %v2545_v57  ;;  %784 = vst [vmem:[#allocation4 + $0x18] sm:$0xff] %v3102_v29  ;;  %785 = vst [vmem:[#allocation4 + $0x20] sm:$0xff] %v3105_v30  ;;  %1356 = vmatprep.mubr.bf16.mxu1 %v2603_v31  ;;  %v2595_v45 = vld [vmem:[%s2972_s30 + $0x90] ss:$8 sps:$4 sm:$0xff]   ;;  %v2601_v49 = vld [vmem:[%s2972_s30 + $0x80] ss:$8 sps:$4 sm:$0xff]   ;;  %v816_v57 = vpack.c.bf16 %v3105_v30, %v3102_v29 }
 0x137   : > { %786 = vst [vmem:[#allocation4 + $0x28] sm:$0xff] %v3110_v33  ;;  %787 = vst [vmem:[#allocation4 + $0x30] sm:$0xff] %v3113_v34  ;;  %1283 = vmatprep.mubr.bf16.mxu0 %v815_v38  ;;  %v2596_v46 = vld [vmem:[%s2972_s30 + $0x190] ss:$8 sps:$4 sm:$0xff]   ;;  %v2602_v50 = vld [vmem:[%s2972_s30 + $0x180] ss:$8 sps:$4 sm:$0xff]  }
 0x138   : > { %1264 = vmatpush1.bf16.msra.mxu0 %v2547_v58  ;;  %788 = vst [vmem:[#allocation4 + $0x38] sm:$0xff] %v3116_v35  ;;  %789 = vst [vmem:[#allocation4 + $0x40] sm:$0xff] %v3119_v36  ;;  %s3141_s22 = scalar_lea.vmem [#allocation4], %s791_s11  ;;  %v2604_v58 = vld [vmem:[%s2989_s12 + $0x8] sm:$0xff]   ;;  %v2607_v26 = vld [vmem:[%s3011_s2 + $0x70] ss:$8 sps:$4 sm:$0xff]  }
 0x139   : > { %1337 = vmatpush1.bf16.msra.mxu1 %v2548_v59  ;;  %1265 = vmatprep.subr.bf16.mxu0 %v2549_v60  ;;  %v2612_v27 = vld [vmem:[%s3011_s2 + $0x64] ss:$8 sps:$4 sm:$0xff]   ;;  %v2610_v28 = vld [vmem:[%s3011_s2 + $0x60] ss:$8 sps:$4 sm:$0xff]   ;;  %v2615_v29 = vld [vmem:[%s3011_s2 + $0x54] ss:$8 sps:$4 sm:$0xff]  }
 0x13a   : > { %1338 = vmatprep.subr.bf16.mxu1 %v2551_v61  ;;  %v2613_v30 = vld [vmem:[%s3011_s2 + $0x50] ss:$8 sps:$4 sm:$0xff]   ;;  %v2618_v31 = vld [vmem:[%s3011_s2 + $0x44] ss:$8 sps:$4 sm:$0xff]   ;;  %s3390_s23 = sld [smem:[#allocation21_spill]] (!%p2294_p3) }
 0x13b   : > { %v2625_v38 = vld [vmem:[%s3011_s2 + $0x10] ss:$8 sps:$4 sm:$0xff]  }
 0x13c   : > { %1266 = vmatpush1.bf16.msra.mxu0 %v2553_v62 }
 0x13d   : > { %1339 = vmatpush1.bf16.msra.mxu1 %v2554_v63  ;;  %1267 = vmatprep.subr.bf16.mxu0 %v2555_v0 }
 0x13e   : > { %1340 = vmatprep.subr.bf16.mxu1 %v2557_v1  ;;  %v817_v1 = vpack.c.bf16 %v3113_v34, %v3110_v33  ;;  %v2621_v33 = vld [vmem:[%s3011_s2 + $0x34] ss:$8 sps:$4 sm:$0xff]   ;;  %v2619_v34 = vld [vmem:[%s3011_s2 + $0x30] ss:$8 sps:$4 sm:$0xff]  }
 0x13f   : > { %v793_v51 = vld [vmem:[%s3141_s22] sm:$0xff]  ;;  %v794_v52 = vld [vmem:[%s3141_s22 + $0x8] sm:$0xff]  ;;  %v2195_v54 = vld [vmem:[%s3146_s10 + $0x10] sm:$0xff] }
 0x140   : > { %1268 = vmatpush2.bf16.msra.mxu0 %v2559_v2  ;;  %v2194_v53 = vld [vmem:[%s3146_s10 + $0x8] sm:$0xff]  ;;  %v811_v55 = vpack.c.bf16 %v794_v52, %v793_v51  ;;  %v795_v59 = vld [vmem:[%s3141_s22 + $0x10] sm:$0xff]  ;;  %v796_v60 = vld [vmem:[%s3141_s22 + $0x18] sm:$0xff] }
 0x141   : > { %1341 = vmatpush2.bf16.msra.mxu1 %v2560_v3  ;;  %1269 = vmatprep.subr.bf16.mxu0 %v2561_v4  ;;  %v819_v56 = vpack.c.bf16 %v2195_v54, %v2194_v53  ;;  %v2196_v61 = vld [vmem:[%s3146_s10 + $0x18] sm:$0xff]  ;;  %v2197_v62 = vld [vmem:[%s3146_s10 + $0x20] sm:$0xff]  ;;  %v812_v63 = vpack.c.bf16 %v796_v60, %v795_v59  ;;  %v2605_v2 = vld [vmem:[%s2989_s12 + $0x10] sm:$0xff]  }
 0x142   : > { %1342 = vmatprep.subr.bf16.mxu1 %v2563_v5  ;;  %v820_v0 = vpack.c.bf16 %v2197_v62, %v2196_v61  ;;  %v797_v3 = vld [vmem:[%s3141_s22 + $0x20] sm:$0xff]  ;;  %v798_v4 = vld [vmem:[%s3141_s22 + $0x28] sm:$0xff] }
 0x143   : > { %v2198_v5 = vld [vmem:[%s3146_s10 + $0x28] sm:$0xff] }
 0x144   : > { %1270 = vmatpush2.bf16.msra.mxu0 %v2565_v6  ;;  %v2199_v6 = vld [vmem:[%s3146_s10 + $0x30] sm:$0xff] }
 0x145   : > { %1343 = vmatpush2.bf16.msra.mxu1 %v2566_v7  ;;  %1271 = vmatprep.subr.bf16.mxu0 %v2567_v8  ;;  %v813_v7 = vpack.c.bf16 %v798_v4, %v797_v3  ;;  %v821_v8 = vpack.c.bf16 %v2199_v6, %v2198_v5 }
 0x146   : > { %1344 = vmatprep.subr.bf16.mxu1 %v2569_v9  ;;  %v818_v9 = vpack.c.bf16 %v3119_v36, %v3116_v35  ;;  %v2624_v35 = vld [vmem:[%s3011_s2 + $0x24] ss:$8 sps:$4 sm:$0xff]   ;;  %v2622_v36 = vld [vmem:[%s3011_s2 + $0x20] ss:$8 sps:$4 sm:$0xff]  }
 0x148   : > { %1272 = vmatpush2.bf16.msra.mxu0 %v2571_v10  ;;  %v2606_v10 = vld [vmem:[%s2989_s12 + $0x18] sm:$0xff]   ;;  %s3388_s12 = sld [smem:[#allocation20_spill]] (!%p2294_p3) }
 0x149   : > { %1345 = vmatpush2.bf16.msra.mxu1 %v2572_v11  ;;  %1273 = vmatprep.subr.bf16.mxu0 %v2573_v12  ;;  %v799_v11 = vld [vmem:[%s3141_s22 + $0x30] sm:$0xff]  ;;  %v800_v12 = vld [vmem:[%s3141_s22 + $0x38] sm:$0xff] }
 0x14a   : > { %1346 = vmatprep.subr.bf16.mxu1 %v2575_v13  ;;  %v2200_v13 = vld [vmem:[%s3146_s10 + $0x38] sm:$0xff] }
 0x14c   : > { %1274 = vmatpush2.bf16.msra.mxu0 %v2577_v14  ;;  %v2201_v14 = vld [vmem:[%s3146_s10 + $0x40] sm:$0xff]  ;;  %s3391_s10 = sld [smem:[#allocation23_spill]] (!%p2294_p3) }
 0x14d   : > { %1347 = vmatpush2.bf16.msra.mxu1 %v2578_v15  ;;  %1275 = vmatprep.subr.bf16.mxu0 %v2579_v17  ;;  %v814_v15 = vpack.c.bf16 %v800_v12, %v799_v11  ;;  %v822_v17 = vpack.c.bf16 %v2201_v14, %v2200_v13 }
 0x14e   : > { %1348 = vmatprep.subr.bf16.mxu1 %v2581_v18  ;;  %v2609_v18 = vld [vmem:[%s3011_s2 + $0x74] ss:$8 sps:$4 sm:$0xff]  }
 0x150   : > { %1276 = vmatpush2.bf16.msra.mxu0 %v2583_v32  ;;  %v2616_v32 = vld [vmem:[%s3011_s2 + $0x40] ss:$8 sps:$4 sm:$0xff]  }
 0x151   : > { %1349 = vmatpush2.bf16.msra.mxu1 %v2584_v37  ;;  %1277 = vmatprep.subr.bf16.mxu0 %v2585_v39  ;;  %v2627_v37 = vld [vmem:[%s3011_s2 + $0x14] ss:$8 sps:$4 sm:$0xff]   ;;  %v2630_v39 = vld [vmem:[%s3011_s2 + $0x4] ss:$8 sps:$4 sm:$0xff]  }
 0x152   : > { %1350 = vmatprep.subr.bf16.mxu1 %v2587_v40  ;;  %v2628_v40 = vld [vmem:[%s3011_s2] ss:$8 sps:$4 sm:$0xff]  }
 0x154   : > { %1278 = vmatpush2.bf16.msra.mxu0 %v2589_v41  ;;  %v2810_v41 = vmov 0  }
 0x155   : > { %1351 = vmatpush2.bf16.msra.mxu1 %v2590_v42  ;;  %1279 = vmatprep.subr.bf16.mxu0 %v2591_v43  ;;  %v921_v42 = vlaneseq }
 0x156   : > { %1352 = vmatprep.subr.bf16.mxu1 %v2593_v44 }
 0x157   : > { %v3189_v43 = vshrl.u32 %v921_v42, 7 }
 0x158   : > { %1280 = vmatpush2.bf16.msra.mxu0 %v2595_v45  ;;  %v919_v45 = vld [vmem:[%s3006_s16] sm:$0x3] }
 0x159   : > { %1353 = vmatpush2.bf16.msra.mxu1 %v2596_v46  ;;  %1281 = vmatprep.subr.bf16.mxu0 %v2597_v47  ;;  %v923_v44 = vsub.s32 0, %v3189_v43  ;;  %v927_v59 = vsub.s32 1, %v3189_v43 }
 0x15a   : > { %1354 = vmatprep.subr.bf16.mxu1 %v2599_v48 }
 0x15b   : > { %v3195_v46 = vrot.slane %v919_v45, %v923_v44  ;;  %v3203_v3 = vrot.slane %v919_v45, %v927_v59 }
 0x15c   : > { %1282 = vmatpush2.bf16.msra.mxu0 %v2601_v49 }
 0x15d   : > { %1355 = vmatpush2.bf16.msra.mxu1 %v2602_v50  ;;  %1573 = vmatprep.subr.bf16.mxu0 %v2609_v18 }
 0x15e   : > { %2409 = vmatprep.subr.bf16.mxu1 %v2609_v18 }
 0x15f   : > { %1284 = vmatmul.mubr.bf16.vlgmr.msra.gmra.mxu0 %v811_v55 }
 0x160   : > { %1357 = vmatmul.mubr.bf16.vlgmr.msra.gmra.mxu1 %v819_v56  ;;  %1293 = vmatprep.mubr.bf16.mxu0 %v816_v57 }
 0x161   : > { %1366 = vmatprep.mubr.bf16.mxu1 %v2604_v58  ;;  %1574 = vmatpush1.bf16.msra.mxu0 %v2607_v26 }
 0x162   : > { %2417 = vmatpush1.bf16.msra.mxu1 %v2607_v26  ;;  %1575 = vmatprep.subr.bf16.mxu0 %v2612_v27 }
 0x163   : > { %2410 = vmatprep.subr.bf16.mxu1 %v2612_v27 }
 0x165   : > { %1576 = vmatpush1.bf16.msra.mxu0 %v2610_v28 }
 0x166   : > { %2418 = vmatpush1.bf16.msra.mxu1 %v2610_v28  ;;  %1577 = vmatprep.subr.bf16.mxu0 %v2615_v29 }
 0x167   : > { %1294 = vmatmul.mubr.bf16.gmra.mxu0 %v812_v63  ;;  %2411 = vmatprep.subr.bf16.mxu1 %v2615_v29 }
 0x168   : > { %1367 = vmatmul.mubr.bf16.gmra.mxu1 %v820_v0  ;;  %1303 = vmatprep.mubr.bf16.mxu0 %v817_v1 }
 0x169   : > { %1376 = vmatprep.mubr.bf16.mxu1 %v2605_v2  ;;  %1578 = vmatpush1.bf16.msra.mxu0 %v2613_v30 }
 0x16a   : > { %2419 = vmatpush1.bf16.msra.mxu1 %v2613_v30  ;;  %1579 = vmatprep.subr.bf16.mxu0 %v2618_v31 }
 0x16b   : > { %2412 = vmatprep.subr.bf16.mxu1 %v2618_v31 }
 0x16d   : > { %1580 = vmatpush1.bf16.msra.mxu0 %v2616_v32 }
 0x16e   : > { %2420 = vmatpush1.bf16.msra.mxu1 %v2616_v32  ;;  %1581 = vmatprep.subr.bf16.mxu0 %v2621_v33 }
 0x16f   : > { %1304 = vmatmul.mubr.bf16.gmra.mxu0 %v813_v7  ;;  %2413 = vmatprep.subr.bf16.mxu1 %v2621_v33 }
 0x170   : > { %1377 = vmatmul.mubr.bf16.gmra.mxu1 %v821_v8  ;;  %1313 = vmatprep.mubr.bf16.mxu0 %v818_v9 }
 0x171   : > { %1386 = vmatprep.mubr.bf16.mxu1 %v2606_v10  ;;  %1582 = vmatpush1.bf16.msra.mxu0 %v2619_v34 }
 0x172   : > { %2421 = vmatpush1.bf16.msra.mxu1 %v2619_v34  ;;  %1583 = vmatprep.subr.bf16.mxu0 %v2624_v35 }
 0x173   : > { %2414 = vmatprep.subr.bf16.mxu1 %v2624_v35 }
 0x175   : > { %1584 = vmatpush1.bf16.msra.mxu0 %v2622_v36 }
 0x176   : > { %2422 = vmatpush1.bf16.msra.mxu1 %v2622_v36  ;;  %1585 = vmatprep.subr.bf16.mxu0 %v2627_v37 }
 0x177   : > { %1314 = vmatmul.mubr.bf16.gmra.mxu0 %v814_v15  ;;  %2415 = vmatprep.subr.bf16.mxu1 %v2627_v37 }
 0x178   : > { %1387 = vmatmul.mubr.bf16.gmra.mxu1 %v822_v17  ;;  %1605 = vmatprep.mubr.bf16.mxu0 %v2810_v41 }
 0x179   : > { %1586 = vmatpush1.bf16.msra.mxu0 %v2625_v38  ;;  %1625 = vmatprep.mubr.bf16.mxu1 %v2810_v41 }
 0x17a   : > { %2423 = vmatpush1.bf16.msra.mxu1 %v2625_v38  ;;  %1587 = vmatprep.subr.bf16.mxu0 %v2630_v39 }
 0x17b   : > { %2416 = vmatprep.subr.bf16.mxu1 %v2630_v39 }
 0x17d   : > { %1588 = vmatpush1.bf16.msra.mxu0 %v2628_v40 }
 0x17e   : > { %2424 = vmatpush1.bf16.msra.mxu1 %v2628_v40 }
 0x21f   : > { %v1285_v47 = vpop.f32.mrf.mxu0 }
 0x220   : > { %v1358_v48 = vpop.f32.mrf.mxu1  ;;  %v1286_v49 = vadd.f32 %v1285_v47, %v3195_v46 }
 0x221   : > { %v1287_v50 = vpop.f32.mrf.mxu0 }
 0x222   : > { %v1360_v51 = vpop.f32.mrf.mxu1  ;;  %v1359_v52 = vadd.f32 %v1358_v48, %v1286_v49  ;;  %v1288_v11 = vadd.f32 %v1287_v50, %v3203_v3 }
 0x223   : > { %v1289_v53 = vpop.f32.mrf.mxu0 }
 0x224   : > { %v1362_v54 = vpop.f32.mrf.mxu1  ;;  %v2270_v55 = vmul.f32 -1.442695, %v1359_v52  ;;  %v1290_v56 = vadd.f32 %v1289_v53, %v3195_v46  ;;  %v1361_v28 = vadd.f32 %v1360_v51, %v1288_v11 }
 0x225   : > { %v1291_v57 = vpop.f32.mrf.mxu0 }
 0x226   : > { %v1364_v58 = vpop.f32.mrf.mxu1  ;;  %2631 = vpow2.f32 %v2270_v55  ;;  %v1363_v60 = vadd.f32 %v1362_v54, %v1290_v56  ;;  %v1292_v18 = vadd.f32 %v1291_v57, %v3203_v3 }
 0x227   : > { %v1295_v61 = vpop.f32.mrf.mxu0 }
 0x228   : > { %v1368_v62 = vpop.f32.mrf.mxu1  ;;  %v2271_v63 = vmul.f32 -1.442695, %v1363_v60  ;;  %v1296_v0 = vadd.f32 %v1295_v61, %v3195_v46  ;;  %v1365_v36 = vadd.f32 %v1364_v58, %v1292_v18 }
 0x229   : > { %v1297_v1 = vpop.f32.mrf.mxu0 }
 0x22a   : > { %v1370_v2 = vpop.f32.mrf.mxu1  ;;  %2633 = vpow2.f32 %v2271_v63  ;;  %v1369_v4 = vadd.f32 %v1368_v62, %v1296_v0  ;;  %v1298_v39 = vadd.f32 %v1297_v1, %v3203_v3 }
 0x22b   : > { %v1299_v5 = vpop.f32.mrf.mxu0 }
 0x22c   : > { %v1372_v6 = vpop.f32.mrf.mxu1  ;;  %v2272_v7 = vmul.f32 -1.442695, %v1369_v4  ;;  %v1300_v8 = vadd.f32 %v1299_v5, %v3195_v46  ;;  %v1371_v54 = vadd.f32 %v1370_v2, %v1298_v39 }
 0x22d   : > { %v1301_v9 = vpop.f32.mrf.mxu0 }
 0x22e   : > { %v1374_v10 = vpop.f32.mrf.mxu1  ;;  %2635 = vpow2.f32 %v2272_v7  ;;  %v1373_v12 = vadd.f32 %v1372_v6, %v1300_v8  ;;  %v1302_v50 = vadd.f32 %v1301_v9, %v3203_v3 }
 0x22f   : > { %v1305_v13 = vpop.f32.mrf.mxu0 }
 0x230   : > { %v1378_v14 = vpop.f32.mrf.mxu1  ;;  %v2273_v15 = vmul.f32 -1.442695, %v1373_v12  ;;  %v1306_v17 = vadd.f32 %v1305_v13, %v3195_v46  ;;  %v1375_v61 = vadd.f32 %v1374_v10, %v1302_v50 }
 0x231   : > { %v1307_v26 = vpop.f32.mrf.mxu0 }
 0x232   : > { %v1380_v27 = vpop.f32.mrf.mxu1  ;;  %2637 = vpow2.f32 %v2273_v15  ;;  %v1379_v29 = vadd.f32 %v1378_v14, %v1306_v17  ;;  %v1308_v5 = vadd.f32 %v1307_v26, %v3203_v3 }
 0x233   : > { %v2632_v30 = vpop.eup %2631  ;;  %v1309_v31 = vpop.f32.mrf.mxu0  ;;  %2639 = vtanh.f32 %v1361_v28 }
 0x234   : > { %v1382_v32 = vpop.f32.mrf.mxu1  ;;  %v1421_v33 = vadd.f32 1.0, %v2632_v30  ;;  %v2274_v34 = vmul.f32 -1.442695, %v1379_v29  ;;  %v1310_v35 = vadd.f32 %v1309_v31, %v3195_v46 }
 0x235   : > { %v1311_v37 = vpop.f32.mrf.mxu0 }
 0x236   : > { %v1384_v38 = vpop.f32.mrf.mxu1  ;;  %v1383_v40 = vadd.f32 %v1382_v32, %v1310_v35  ;;  %2641 = vpow2.f32 %v2274_v34  ;;  %v1312_v2 = vadd.f32 %v1311_v37, %v3203_v3 }
 0x237   : > { %v2634_v42 = vpop.eup %2633  ;;  %v1315_v45 = vpop.f32.mrf.mxu0  ;;  %2643 = vrcp.f32 %v1421_v33 }
 0x238   : > { %v1388_v47 = vpop.f32.mrf.mxu1  ;;  %v1422_v48 = vadd.f32 1.0, %v2634_v42  ;;  %v2275_v49 = vmul.f32 -1.442695, %v1383_v40  ;;  %2645 = vtanh.f32 %v1365_v36  ;;  %v1316_v51 = vadd.f32 %v1315_v45, %v3195_v46 }
 0x239   : > { %v1317_v52 = vpop.f32.mrf.mxu0  ;;  %v1385_v12 = vadd.f32 %v1384_v38, %v1312_v2 }
 0x23a   : > { %v1390_v53 = vpop.f32.mrf.mxu1  ;;  %2647 = vrcp.f32 %v1422_v48  ;;  %v1389_v56 = vadd.f32 %v1388_v47, %v1316_v51  ;;  %v1318_v17 = vadd.f32 %v1317_v52, %v3203_v3 }
 0x23b   : > { %v2636_v55 = vpop.eup %2635  ;;  %2649 = vpow2.f32 %v2275_v49  ;;  %v1319_v57 = vpop.f32.mrf.mxu0 }
 0x23c   : > { %v1423_v58 = vadd.f32 1.0, %v2636_v55  ;;  %v1320_v60 = vadd.f32 %v1319_v57, %v3195_v46  ;;  %v2276_v62 = vmul.f32 -1.442695, %v1389_v56  ;;  %v1392_v63 = vpop.f32.mrf.mxu1  ;;  %2651 = vtanh.f32 %v1371_v54 }
 0x23d   : > { %v1381_v46 = vadd.f32 %v1380_v27, %v1308_v5  ;;  %v1321_v14 = vpop.f32.mrf.mxu0  ;;  %v1391_v32 = vadd.f32 %v1390_v53, %v1318_v17 }
 0x23e   : > { %v1393_v0 = vadd.f32 %v1392_v63, %v1320_v60  ;;  %2653 = vpow2.f32 %v2276_v62  ;;  %v1322_v29 = vadd.f32 %v1321_v14, %v3203_v3  ;;  %v1394_v35 = vpop.f32.mrf.mxu1  ;;  %v1481_v62 = vld [vmem:[%s3016_s27] sm:$0x3] }
 0x23f   : > { %v2638_v1 = vpop.eup %2637  ;;  %2655 = vrcp.f32 %v1423_v58  ;;  %v3223_v63 = vrot.slane %v1481_v62, %v923_v44 }
 0x240   : > { %v1424_v4 = vadd.f32 1.0, %v2638_v1  ;;  %v2277_v6 = vmul.f32 -1.442695, %v1393_v0  ;;  %2657 = vtanh.f32 %v1375_v61  ;;  %v2640_v7 = vpop.eup %2639  ;;  %v1395_v37 = vadd.f32 %v1394_v35, %v1322_v29 }
 0x241   : > { %v3227_v0 = vrot.slane %v1481_v62, %v927_v59  ;;  %v1677_v62 = vld [vmem:[#allocation3 + $0x38] sm:$0xff] }
 0x242   : > { %2659 = vrcp.f32 %v1424_v4 }
 0x243   : > { %2661 = vpow2.f32 %v2277_v6  ;;  %v2642_v8 = vpop.eup %2641 }
 0x244   : > { %v2644_v9 = vpop.eup %2643  ;;  %v1425_v10 = vadd.f32 1.0, %v2642_v8  ;;  %2663 = vtanh.f32 %v1381_v46 }
 0x245   : > { %v2646_v11 = vpop.eup %2645  ;;  %v1453_v18 = vmul.f32 %v2644_v9, %v2640_v7 }
 0x246   : > { %2665 = vrcp.f32 %v1425_v10  ;;  %v1671_v10 = vld [vmem:[#allocation3 + $0x18] sm:$0xff] }
 0x247   : > { %v2648_v13 = vpop.eup %2647  ;;  %2667 = vtanh.f32 %v1385_v12 }
 0x248   : > { %v2650_v15 = vpop.eup %2649  ;;  %v1454_v26 = vmul.f32 %v2648_v13, %v2646_v11 }
 0x249   : > { %v1426_v28 = vadd.f32 1.0, %v2650_v15  ;;  %v2652_v31 = vpop.eup %2651  ;;  %v1672_v15 = vld [vmem:[#allocation3 + $0x10] sm:$0xff] }
 0x24a   : > { %v1461_v30 = vpack.c.bf16 %v1454_v26, %v1453_v18 }
 0x24b   : > { %2669 = vrcp.f32 %v1426_v28  ;;  %v2654_v27 = vpop.eup %2653 }
 0x24c   : > { %1606 = vmatmul.mubr.bf16.vlgmr.msra.gmra.mxu0 %v1461_v30  ;;  %v2656_v33 = vpop.eup %2655  ;;  %v1427_v34 = vadd.f32 1.0, %v2654_v27  ;;  %2671 = vtanh.f32 %v1391_v32 }
 0x24d   : > { %1615 = vmatprep.mubr.bf16.mxu0 %v2810_v41  ;;  %v2658_v36 = vpop.eup %2657  ;;  %v1455_v40 = vmul.f32 %v2656_v33, %v2652_v31  ;;  %v1673_v31 = vld [vmem:[#allocation3 + $0x20] sm:$0xff] }
 0x24e   : > { %2673 = vrcp.f32 %v1427_v34 }
 0x24f   : > { %v2660_v38 = vpop.eup %2659  ;;  %2675 = vtanh.f32 %v1395_v37  ;;  %v1674_v37 = vld [vmem:[#allocation3 + $0x28] sm:$0xff] }
 0x250   : > { %v2662_v39 = vpop.eup %2661  ;;  %v1456_v42 = vmul.f32 %v2660_v38, %v2658_v36 }
 0x251   : > { %v1428_v3 = vadd.f32 1.0, %v2662_v39  ;;  %v2664_v47 = vpop.eup %2663 }
 0x252   : > { %v1462_v45 = vpack.c.bf16 %v1456_v42, %v1455_v40 }
 0x253   : > { %2677 = vrcp.f32 %v1428_v3  ;;  %v2666_v48 = vpop.eup %2665 }
 0x254   : > { %1616 = vmatmul.mubr.bf16.gmra.mxu0 %v1462_v45  ;;  %v2668_v49 = vpop.eup %2667  ;;  %v1457_v51 = vmul.f32 %v2666_v48, %v2664_v47  ;;  %v1675_v47 = vld [vmem:[#allocation3 + $0x8] sm:$0xff] }
 0x258   : > { %v2670_v50 = vpop.eup %2669 }
 0x259   : > { %v1458_v52 = vmul.f32 %v2670_v50, %v2668_v49  ;;  %v2672_v54 = vpop.eup %2671 }
 0x25b   : > { %v1463_v53 = vpack.c.bf16 %v1458_v52, %v1457_v51  ;;  %v2674_v55 = vpop.eup %2673 }
 0x25c   : > { %v2676_v56 = vpop.eup %2675  ;;  %v1459_v58 = vmul.f32 %v2674_v55, %v2672_v54  ;;  %v1676_v54 = vld [vmem:[#allocation3 + $0x30] sm:$0xff] }
 0x25d   : > { %1626 = vmatmul.mubr.bf16.vlgmr.msra.gmra.mxu1 %v1463_v53 }
 0x25e   : > { %1635 = vmatprep.mubr.bf16.mxu1 %v2810_v41  ;;  %v1670_v41 = vld [vmem:[#allocation3] sm:$0xff] }
 0x260   : > { %v2678_v57 = vpop.eup %2677 }
 0x261   : > { %v1460_v60 = vmul.f32 %v2678_v57, %v2676_v56 }
 0x263   : > { %v1464_v61 = vpack.c.bf16 %v1460_v60, %v1459_v58 }
 0x265   : > { %1636 = vmatmul.mubr.bf16.gmra.mxu1 %v1464_v61 }
 0x30c   : > { %v1607_v1 = vpop.f32.mrf.mxu0 }
 0x30d   : > { %v1608_v4 = vadd.f32 %v1607_v1, %v3223_v63 }
 0x30e   : > { %v1609_v5 = vpop.f32.mrf.mxu0 }
 0x30f   : > { %v1646_v6 = vadd.f32 %v1608_v4, %v3073_v16  ;;  %v1610_v2 = vadd.f32 %v1609_v5, %v3227_v0 }
 0x310   : > { %v1611_v7 = vpop.f32.mrf.mxu0 }
 0x311   : > { %v1654_v8 = vmul.f32 0.70710677, %v1646_v6  ;;  %v1678_v46 = vadd.f32 %v1670_v41, %v1610_v2  ;;  %v1612_v9 = vadd.f32 %v1611_v7, %v3223_v63 }
 0x312   : > { %v1613_v44 = vpop.f32.mrf.mxu0 }
 0x313   : > { %1662 = vst [vmem:[#allocation2 + $0x30] sm:$0xff] %v1654_v8  ;;  %1686 = vst [vmem:[#allocation3] sm:$0xff] %v1678_v46  ;;  %v1647_v43 = vadd.f32 %v1612_v9, %v3077_v19  ;;  %v1614_v59 = vadd.f32 %v1613_v44, %v3227_v0 }
 0x314   : > { %v1617_v11 = vpop.f32.mrf.mxu0 }
 0x315   : > { %v1655_v12 = vmul.f32 0.70710677, %v1647_v43  ;;  %v1679_v13 = vadd.f32 %v1671_v10, %v1614_v59  ;;  %v1618_v16 = vadd.f32 %v1617_v11, %v3223_v63 }
 0x316   : > { %v1619_v14 = vpop.f32.mrf.mxu0 }
 0x317   : > { %1663 = vst [vmem:[#allocation2] sm:$0xff] %v1655_v12  ;;  %1687 = vst [vmem:[#allocation3 + $0x18] sm:$0xff] %v1679_v13  ;;  %v1648_v17 = vadd.f32 %v1618_v16, %v3079_v20  ;;  %v1620_v18 = vadd.f32 %v1619_v14, %v3227_v0 }
 0x318   : > { %v1621_v26 = vpop.f32.mrf.mxu0 }
 0x319   : > { %v1656_v28 = vmul.f32 0.70710677, %v1648_v17  ;;  %v1680_v29 = vadd.f32 %v1672_v15, %v1620_v18  ;;  %v1622_v19 = vadd.f32 %v1621_v26, %v3223_v63 }
 0x31a   : > { %v1623_v30 = vpop.f32.mrf.mxu0 }
 0x31b   : > { %1664 = vst [vmem:[#allocation2 + $0x18] sm:$0xff] %v1656_v28  ;;  %1688 = vst [vmem:[#allocation3 + $0x10] sm:$0xff] %v1680_v29  ;;  %v1649_v27 = vadd.f32 %v1622_v19, %v3081_v21  ;;  %v1624_v32 = vadd.f32 %v1623_v30, %v3227_v0 }
 0x31d   : > { %v1657_v33 = vmul.f32 0.70710677, %v1649_v27  ;;  %v1681_v34 = vadd.f32 %v1673_v31, %v1624_v32  ;;  %v1627_v35 = vpop.f32.mrf.mxu1 }
 0x31e   : > { %v1628_v20 = vadd.f32 %v1627_v35, %v3223_v63 }
 0x31f   : > { %1665 = vst [vmem:[#allocation2 + $0x10] sm:$0xff] %v1657_v33  ;;  %1689 = vst [vmem:[#allocation3 + $0x20] sm:$0xff] %v1681_v34  ;;  %v1629_v36 = vpop.f32.mrf.mxu1 }
 0x320   : > { %v1650_v38 = vadd.f32 %v1628_v20, %v3083_v22  ;;  %v1630_v39 = vadd.f32 %v1629_v36, %v3227_v0 }
 0x321   : > { %v1631_v40 = vpop.f32.mrf.mxu1 }
 0x322   : > { %v1658_v42 = vmul.f32 0.70710677, %v1650_v38  ;;  %v1682_v3 = vadd.f32 %v1674_v37, %v1630_v39  ;;  %v1632_v21 = vadd.f32 %v1631_v40, %v3223_v63 }
 0x323   : > { %v1633_v45 = vpop.f32.mrf.mxu1 }
 0x324   : > { %1666 = vst [vmem:[#allocation2 + $0x8] sm:$0xff] %v1658_v42  ;;  %1690 = vst [vmem:[#allocation3 + $0x28] sm:$0xff] %v1682_v3  ;;  %v1651_v48 = vadd.f32 %v1632_v21, %v3085_v23  ;;  %v1634_v49 = vadd.f32 %v1633_v45, %v3227_v0 }
 0x325   : > { %v1637_v50 = vpop.f32.mrf.mxu1 }
 0x326   : > { %v1659_v51 = vmul.f32 0.70710677, %v1651_v48  ;;  %v1683_v52 = vadd.f32 %v1675_v47, %v1634_v49  ;;  %v1638_v22 = vadd.f32 %v1637_v50, %v3223_v63 }
 0x327   : > { %v1639_v53 = vpop.f32.mrf.mxu1 }
 0x328   : > { %1667 = vst [vmem:[#allocation2 + $0x20] sm:$0xff] %v1659_v51  ;;  %1691 = vst [vmem:[#allocation3 + $0x8] sm:$0xff] %v1683_v52  ;;  %v1652_v55 = vadd.f32 %v1638_v22, %v3087_v24  ;;  %v1640_v56 = vadd.f32 %v1639_v53, %v3227_v0 }
 0x329   : > { %v1641_v57 = vpop.f32.mrf.mxu1 }
 0x32a   : > { %v1660_v58 = vmul.f32 0.70710677, %v1652_v55  ;;  %v1684_v60 = vadd.f32 %v1676_v54, %v1640_v56  ;;  %v1642_v23 = vadd.f32 %v1641_v57, %v3223_v63 }
 0x32b   : > { %v1643_v61 = vpop.f32.mrf.mxu1 }
 0x32c   : > { %1668 = vst [vmem:[#allocation2 + $0x28] sm:$0xff] %v1660_v58  ;;  %1692 = vst [vmem:[#allocation3 + $0x30] sm:$0xff] %v1684_v60  ;;  %v1653_v1 = vadd.f32 %v1642_v23, %v3089_v25  ;;  %v1644_v4 = vadd.f32 %v1643_v61, %v3227_v0  ;;  %1697 = sbr.rel (%p2294_p3) target bundleno = 1266 (0x4f2), region = 84 }
 0x32e   : > { %v1661_v5 = vmul.f32 0.70710677, %v1653_v1  ;;  %v1685_v41 = vadd.f32 %v1677_v62, %v1644_v4 }
 0x330   : > { %1669 = vst [vmem:[#allocation2 + $0x38] sm:$0xff] %v1661_v5  ;;  %1693 = vst [vmem:[#allocation3 + $0x38] sm:$0xff] %v1685_v41 }
 0x331   : > { %v2679_v24 = vld [vmem:[%s3388_s12 + $0x38] sm:$0xff]   ;;  %v2680_v63 = vld [vmem:[%s3388_s12 + $0x30] sm:$0xff]   ;;  %v2681_v25 = vld [vmem:[%s3388_s12 + $0x28] sm:$0xff]   ;;  %vm2002_vm2 = vcmask 64512  }
 0x332   : > { %2359 = vmatprep.subr.bf16.mxu0 %v2679_v24  ;;  %v2682_v0 = vld [vmem:[%s3388_s12 + $0x20] sm:$0xff]   ;;  %v1699_v2 = vld [vmem:[#allocation3 + $0x18] sm:$0xff]  ;;  %v2688_v10 = vld [vmem:[%s3389_s6 + $0x30] sm:$0xff]  }
 0x333   : > { %2360 = vmatpush3.bf16.msra.mxu0 %v2679_v24  ;;  %v1698_v6 = vld [vmem:[#allocation3] sm:$0xff]  ;;  %v1707_v8 = vmul.f32 0.5, %v1699_v2  ;;  %v2687_v46 = vld [vmem:[%s3389_s6 + $0x38] sm:$0xff]   ;;  %v2689_v43 = vld [vmem:[%s3389_s6 + $0x28] sm:$0xff]  }
 0x334   : > { %2361 = vmatprep.subr.bf16.mxu0 %v2680_v63  ;;  %v1706_v7 = vmul.f32 0.5, %v1698_v6  ;;  %v2683_v9 = vld [vmem:[%s3388_s12 + $0x18] sm:$0xff]   ;;  %2383 = vmatprep.subr.bf16.mxu1 %v2687_v46  ;;  %v2684_v59 = vld [vmem:[%s3388_s12 + $0x10] sm:$0xff]   ;;  %v2690_v11 = vld [vmem:[%s3389_s6 + $0x20] sm:$0xff]  }
 0x335   : > { %2384 = vmatpush3.bf16.msra.mxu1 %v2687_v46  ;;  %v2685_v12 = vld [vmem:[%s3388_s12 + $0x8] sm:$0xff]   ;;  %v2691_v13 = vld [vmem:[%s3389_s6 + $0x18] sm:$0xff]   ;;  %v1700_v16 = vld [vmem:[#allocation3 + $0x10] sm:$0xff] }
 0x336   : > { %v1714_v44 = vpack.c.bf16 %v1707_v8, %v1706_v7  ;;  %2385 = vmatprep.subr.bf16.mxu1 %v2688_v10  ;;  %v1701_v14 = vld [vmem:[#allocation3 + $0x20] sm:$0xff]  ;;  %v1702_v17 = vld [vmem:[#allocation3 + $0x28] sm:$0xff]  ;;  %v1708_v26 = vmul.f32 0.5, %v1700_v16  ;;  %v1704_v27 = vld [vmem:[#allocation3 + $0x30] sm:$0xff] }
 0x337   : > { %2362 = vmatpush3.bf16.msra.mxu0 %v2680_v63  ;;  %v2686_v15 = vld [vmem:[%s3388_s12] sm:$0xff]   ;;  %v1703_v18 = vld [vmem:[#allocation3 + $0x8] sm:$0xff]  ;;  %v1709_v28 = vmul.f32 0.5, %v1701_v14  ;;  %v1710_v29 = vmul.f32 0.5, %v1702_v17  ;;  %v1705_v32 = vld [vmem:[#allocation3 + $0x38] sm:$0xff]  ;;  %v1712_v33 = vmul.f32 0.5, %v1704_v27 }
 0x338   : > { %2363 = vmatprep.subr.bf16.mxu0 %v2681_v25  ;;  %2375 = vmatprep.mubr.bf16.mxu0 %v1714_v44  ;;  %v1711_v19 = vmul.f32 0.5, %v1703_v18  ;;  %v1713_v34 = vmul.f32 0.5, %v1705_v32  ;;  %v2692_v20 = vld [vmem:[%s3389_s6 + $0x10] sm:$0xff]   ;;  %v2693_v36 = vld [vmem:[%s3389_s6 + $0x8] sm:$0xff]   ;;  %v2694_v37 = vld [vmem:[%s3389_s6] sm:$0xff]  }
 0x339   : > { %2386 = vmatpush3.bf16.msra.mxu1 %v2688_v10  ;;  %v1715_v30 = vpack.c.bf16 %v1709_v28, %v1708_v26  ;;  %v2295_v40 = vld [vmem:[%s3390_s23] ss:$0 sm:$0xff] }
 0x33a   : > { %2387 = vmatprep.subr.bf16.mxu1 %v2689_v43  ;;  %v1716_v31 = vpack.c.bf16 %v1711_v19, %v1710_v29  ;;  %v1717_v35 = vpack.c.bf16 %v1713_v34, %v1712_v33  ;;  %v2304_v63 = vld [vmem:[%s3391_s10] ss:$0 sm:$0xff] }
 0x33b   : > { %2364 = vmatpush3.bf16.msra.mxu0 %v2681_v25 }
 0x33c   : > { %2365 = vmatprep.subr.bf16.mxu0 %v2682_v0 }
 0x33d   : > { %2388 = vmatpush3.bf16.msra.mxu1 %v2689_v43 }
 0x33e   : > { %2389 = vmatprep.subr.bf16.mxu1 %v2690_v11 }
 0x33f   : > { %2366 = vmatpush3.bf16.msra.mxu0 %v2682_v0 }
 0x340   : > { %2367 = vmatprep.subr.bf16.mxu0 %v2683_v9 }
 0x341   : > { %2390 = vmatpush3.bf16.msra.mxu1 %v2690_v11 }
 0x342   : > { %2391 = vmatprep.subr.bf16.mxu1 %v2691_v13 }
 0x343   : > { %2368 = vmatpush3.bf16.msra.mxu0 %v2683_v9 }
 0x344   : > { %2369 = vmatprep.subr.bf16.mxu0 %v2684_v59 }
 0x345   : > { %2392 = vmatpush3.bf16.msra.mxu1 %v2691_v13 }
 0x346   : > { %2393 = vmatprep.subr.bf16.mxu1 %v2692_v20 }
 0x347   : > { %2370 = vmatpush3.bf16.msra.mxu0 %v2684_v59 }
 0x348   : > { %2371 = vmatprep.subr.bf16.mxu0 %v2685_v12 }
 0x349   : > { %2394 = vmatpush3.bf16.msra.mxu1 %v2692_v20 }
 0x34a   : > { %2395 = vmatprep.subr.bf16.mxu1 %v2693_v36 }
 0x34b   : > { %2372 = vmatpush3.bf16.msra.mxu0 %v2685_v12 }
 0x34c   : > { %2373 = vmatprep.subr.bf16.mxu0 %v2686_v15 }
 0x34d   : > { %2396 = vmatpush3.bf16.msra.mxu1 %v2693_v36 }
 0x34e   : > { %2397 = vmatprep.subr.bf16.mxu1 %v2694_v37 }
 0x34f   : > { %2374 = vmatpush3.bf16.msra.mxu0 %v2686_v15 }
 0x351   : > { %2398 = vmatpush3.bf16.msra.mxu1 %v2694_v37 }
 0x352   : > { %2376 = vmatmul.mubr.bf16.vlgmr.msra.gmra.mxu0 %v1715_v30 }
 0x353   : > { %2379 = vmatprep.mubr.bf16.mxu0 %v1716_v31 }
 0x35a   : > { %2380 = vmatmul.mubr.bf16.gmra.mxu0 %v1717_v35 }
 0x412   : > { %v2377_v38 = vpop.f32.mrf.mxu0 }
 0x413   : > { %v1832_v45 = vadd.f32 %v2377_v38, %v2295_v40 }
 0x414   : > { %v1823_v39 = vpop.f32.mrf.mxu0 }
 0x415   : > { %v1824_v3 = vadd.f32 %v2295_v40, %v1823_v39  ;;  %v1856_v22 = vmax.f32 %v1832_v45, 0.0 }
 0x416   : > { %v2378_v42 = vpop.f32.mrf.mxu0 }
 0x417   : > { %v1835_v21 = vadd.f32 %v2378_v42, %v2295_v40  ;;  %v1854_v51 = vmax.f32 %v1824_v3, 0.0 }
 0x418   : > { %v1826_v47 = vpop.f32.mrf.mxu0 }
 0x419   : > { %v1827_v48 = vadd.f32 %v2295_v40, %v1826_v47  ;;  %v1857_v49 = vmax.f32 %v1835_v21, 0.0 }
 0x41a   : > { %v2381_v50 = vpop.f32.mrf.mxu0 }
 0x41b   : > { %v1855_v52 = vmax.f32 %v1827_v48, 0.0  ;;  %v1863_v55 = vpack.c.bf16 %v1857_v49, %v1856_v22  ;;  %v1848_v60 = vadd.f32 %v2381_v50, %v2295_v40 }
 0x41c   : > { %v1839_v53 = vpop.f32.mrf.mxu0 }
 0x41d   : > { %v1862_v54 = vpack.c.bf16 %v1855_v52, %v1854_v51  ;;  %v1840_v57 = vadd.f32 %v2295_v40, %v1839_v53  ;;  %v1860_v5 = vmax.f32 %v1848_v60, 0.0 }
 0x41e   : > { %v2382_v56 = vpop.f32.mrf.mxu0 }
 0x41f   : > { %v1851_v58 = vadd.f32 %v2382_v56, %v2295_v40  ;;  %2399 = vmatprep.mubr.bf16.mxu1 %v1862_v54  ;;  %v1858_v1 = vmax.f32 %v1840_v57, 0.0 }
 0x420   : > { %v1842_v23 = vpop.f32.mrf.mxu0  ;;  %2400 = vmatmul.mubr.bf16.vlgmr.msra.gmra.mxu1 %v1863_v55 }
 0x421   : > { %v1843_v61 = vadd.f32 %v2295_v40, %v1842_v23  ;;  %v1861_v62 = vmax.f32 %v1851_v58, 0.0 }
 0x423   : > { %v1859_v4 = vmax.f32 %v1843_v61, 0.0  ;;  %v1865_v24 = vpack.c.bf16 %v1861_v62, %v1860_v5 }
 0x425   : > { %v1864_v41 = vpack.c.bf16 %v1859_v4, %v1858_v1 }
 0x427   : > { %2403 = vmatprep.mubr.bf16.mxu1 %v1864_v41 }
 0x428   : > { %2404 = vmatmul.mubr.bf16.gmra.mxu1 %v1865_v24 }
 0x4e0   : > { %v2401_v25 = vpop.f32.mrf.mxu1 }
 0x4e1   : > { %v1980_v0 = vadd.f32 %v2401_v25, %v2304_v63 }
 0x4e2   : > { %v1971_v6 = vpop.f32.mrf.mxu1 }
 0x4e3   : > { %2005 = vst.msk [vmem:[%s3001_s21 + $0x10] sm:$0xff] %vm2002_vm2, %v1980_v0  ;;  %v1972_v2 = vadd.f32 %v2304_v63, %v1971_v6 }
 0x4e4   : > { %v2402_v7 = vpop.f32.mrf.mxu1 }
 0x4e5   : > { %2003 = vst.msk [vmem:[%s3001_s21] sm:$0xff] %vm2002_vm2, %v1972_v2  ;;  %v1983_v8 = vadd.f32 %v2402_v7, %v2304_v63 }
 0x4e6   : > { %v1974_v46 = vpop.f32.mrf.mxu1 }
 0x4e7   : > { %2006 = vst.msk [vmem:[%s3001_s21 + $0x18] sm:$0xff] %vm2002_vm2, %v1983_v8  ;;  %v1975_v9 = vadd.f32 %v2304_v63, %v1974_v46 }
 0x4e8   : > { %v2405_v44 = vpop.f32.mrf.mxu1 }
 0x4e9   : > { %2004 = vst.msk [vmem:[%s3001_s21 + $0x8] sm:$0xff] %vm2002_vm2, %v1975_v9  ;;  %v1996_v10 = vadd.f32 %v2405_v44, %v2304_v63 }
 0x4ea   : > { %v1987_v43 = vpop.f32.mrf.mxu1 }
 0x4eb   : > { %2009 = vst.msk [vmem:[%s3001_s21 + $0x30] sm:$0xff] %vm2002_vm2, %v1996_v10  ;;  %v1988_v59 = vadd.f32 %v2304_v63, %v1987_v43 }
 0x4ec   : > { %v2406_v11 = vpop.f32.mrf.mxu1 }
 0x4ed   : > { %2007 = vst.msk [vmem:[%s3001_s21 + $0x20] sm:$0xff] %vm2002_vm2, %v1988_v59  ;;  %v1999_v12 = vadd.f32 %v2406_v11, %v2304_v63 }
 0x4ee   : > { %v1990_v13 = vpop.f32.mrf.mxu1 }
 0x4ef   : > { %2010 = vst.msk [vmem:[%s3001_s21 + $0x38] sm:$0xff] %vm2002_vm2, %v1999_v12  ;;  %v1991_v16 = vadd.f32 %v2304_v63, %v1990_v13 }
 0x4f1   : > { %2008 = vst.msk [vmem:[%s3001_s21 + $0x28] sm:$0xff] %vm2002_vm2, %v1991_v16 }
 0x4f2 PF: > { %s33_s24 = sadd.s32 1, %s2803_s24   ;;  %s3392_s2 = sld [smem:[#allocation11_spill]] }
 0x4f3   : > { %p30_p4 = scmp.ge.s32.totalorder %s33_s24, 10   ;;  %s3393_s0 = sld [smem:[#allocation16_spill]] }
 0x4f4   : > { %s3394_s20 = sld [smem:[#allocation12_spill]]  ;;  %s3398_s18 = smov %s2779_s19 }
 0x4f5   : > { %s3395_s21 = sld [smem:[#allocation13_spill]]  ;;  %32 = sbr.rel (!%p30_p4) target bundleno = 22 (0x16), region = 140 }
 0x4f6   : > { %s3396_s22 = sld [smem:[#allocation14_spill]] }
 0x4f7   : > { %s3397_s23 = sld [smem:[#allocation15_spill]] }
 0x4f8   : > { %s3399_s19 = smov %s3392_s2 }
 0x4fa   :  { %2032 = vsyncpa [#allocation8], 1 }
 0x4fb   :  { %2034 = vsyncpa [#allocation8 + $0x1], 1 }

</bundles_post_ra>
